<compile_context>
chip_gen: v7x
topology: tpu7x:2x2x1
jax: 0.10.0
libtpu: 0.0.40
codegen_flags: <defaults>
</compile_context>

<pallas_src>
import jax
import jax.numpy as jnp
from jax.experimental import pallas as pl
from jax.experimental.pallas import tpu as pltpu

CLASS_NUM = 10            # `class_num` is an external global in the torch source
L_IN = 42                 # conv out = 40, pool out = 20 -> 32*20 = 640 = fc1.in_features
C_OUT = 32
K = 3
L_CONV = L_IN - K + 1     # 40
L_POOL = L_CONV // 2      # 20
HID = 16
FLAT = C_OUT * L_POOL     # 640


def _round_up(x, m):
    return (x + m - 1) // m * m


def cnn_kernel(x_ref, wc_ref, bc_ref, w1_ref, b1_ref, w2_ref, b2_ref, out_ref):
    # x_ref: (L_IN, TB) -- batch tile on the lane axis.
    xv = x_ref[...]                                   # (42, TB)
    tb = xv.shape[-1]
    wcv = wc_ref[...]                                 # (32, 3)
    bcv = bc_ref[...]                                 # (32, 1)

    # Conv1d(1, 32, kernel_size=3) at all 40 positions via contiguous static slices.
    h = bcv[None, :, :]                               # (1, 32, 1) -> broadcasts up
    for k in range(K):
        a_k = xv[k:k + L_CONV, :]                     # (40, TB)
        w_k = wcv[:, k:k + 1][None, :, :]             # (1, 32, 1)
        h = h + a_k[:, None, :] * w_k                 # (40, 32, TB)

    # MaxPool1d(2) over adjacent positions, then ReLU (relu commutes with max).
    hr = h.reshape(L_POOL, 2, C_OUT, tb)              # free leading-dim split
    pooled = jnp.maximum(jnp.maximum(hr[:, 0], hr[:, 1]), 0.0)   # (20, 32, TB)

    # Flatten (l-major; fc1 weight rows were permuted in the wrapper to compensate).
    # Tile-aligned reshape -> no per-channel copy loop, no VMEM scratch round-trip.
    flat = pooled.reshape(FLAT, tb)                   # (640, TB)

    # fc1 + ReLU : (16, 640) @ (640, TB) -- lane-dense MXU matmul.
    y1 = jnp.dot(w1_ref[...], flat, preferred_element_type=jnp.float32) + b1_ref[...]
    y1 = jnp.maximum(y1, 0.0)                         # (16, TB)

    # fc2 : (10, 16) @ (16, TB)
    y2 = jnp.dot(w2_ref[...], y1, preferred_element_type=jnp.float32) + b2_ref[...]

    # softmax over the class axis (sublanes); batch stays lane-dense for the store.
    m = jnp.max(y2, axis=0, keepdims=True)            # (1, TB)
    e = jnp.exp(y2 - m)                               # (10, TB)
    inv = pl.reciprocal(jnp.sum(e, axis=0, keepdims=True))   # exact recip, one per sample
    out_ref[...] = (e * inv).astype(out_ref.dtype)


def cnn_forward(x, params, tb=256):
    """x: (B, 1, L_IN) float32 (torch NCL).  Returns (B, CLASS_NUM) softmax probs."""
    wc, bc, w1, b1, w2, b2 = params
    B = x.shape[0]
    xs = x[:, 0, :].astype(jnp.float32)               # (B, 42)

    TB = min(tb, _round_up(B, 128))                   # batch tile (lane axis), >= 128
    Bp = _round_up(B, TB)
    xsT = jnp.zeros((L_IN, Bp), jnp.float32).at[:, :B].set(xs.T)   # (42, Bp), batch on lanes

    # Kernel-layout parameters (tiny; computed once per call).
    wc2 = wc.reshape(C_OUT, K)                        # (32, 3)
    bc2 = bc.reshape(C_OUT, 1)                        # (32, 1)
    # Permute fc1 weight rows so the kernel's l-major flatten matches torch's c-major flatten.
    w1t = (w1.reshape(C_OUT, L_POOL, HID)
             .transpose(1, 0, 2)
             .reshape(FLAT, HID)).T                   # (16, 640), col index = l*32 + c
    b1c = b1.reshape(HID, 1)                          # (16, 1)
    w2t = w2.reshape(HID, CLASS_NUM).T                # (10, 16)
    b2c = b2.reshape(CLASS_NUM, 1)                    # (10, 1)

    outT = pl.pallas_call(
        cnn_kernel,
        out_shape=jax.ShapeDtypeStruct((CLASS_NUM, Bp), jnp.float32),
        grid=(Bp // TB,),
        in_specs=[
            pl.BlockSpec((L_IN, TB), lambda i: (0, i)),          # x (raw signal, batch on lanes)
            pl.BlockSpec((C_OUT, K), lambda i: (0, 0)),          # conv weight
            pl.BlockSpec((C_OUT, 1), lambda i: (0, 0)),          # conv bias
            pl.BlockSpec((HID, FLAT), lambda i: (0, 0)),         # fc1 weight (permuted, transposed)
            pl.BlockSpec((HID, 1), lambda i: (0, 0)),            # fc1 bias
            pl.BlockSpec((CLASS_NUM, HID), lambda i: (0, 0)),    # fc2 weight (transposed)
            pl.BlockSpec((CLASS_NUM, 1), lambda i: (0, 0)),      # fc2 bias
        ],
        out_specs=pl.BlockSpec((CLASS_NUM, TB), lambda i: (0, i)),
        compiler_params=pltpu.CompilerParams(dimension_semantics=("parallel",)),
    )(xsT, wc2, bc2, w1t, b1c, w2t, b2c)

    return outT[:, :B].T                              # (B, CLASS_NUM)


def ref_forward(x, params):
    """Pure-JAX reference matching the PyTorch forward exactly."""
    wc, bc, w1, b1, w2, b2 = params
    B = x.shape[0]
    xs = x[:, 0, :]                                                   # (B, 42)
    idx = jnp.arange(L_CONV)[:, None] + jnp.arange(K)[None, :]        # (40, 3)
    patches = xs[:, idx]                                              # (B, 40, 3)
    h = jnp.einsum('blk,ck->bcl', patches, wc.reshape(C_OUT, K))
    h = h + bc.reshape(1, C_OUT, 1)                                   # (B, 32, 40)
    h = jnp.maximum(h, 0.0)
    pooled = jnp.max(h.reshape(B, C_OUT, L_POOL, 2), axis=-1)         # (B, 32, 20)
    flat = pooled.reshape(B, FLAT)                                    # (B, 640)
    y1 = jnp.maximum(flat @ w1.reshape(FLAT, HID) + b1.reshape(1, HID), 0.0)
    y2 = y1 @ w2.reshape(HID, CLASS_NUM) + b2.reshape(1, CLASS_NUM)
    return jax.nn.softmax(y2, axis=1)


def init_params(key):
    ks = jax.random.split(key, 6)
    wc = 0.2 * jax.random.normal(ks[0], (C_OUT, K), jnp.float32)        # conv1.weight (32,1,3) squeezed
    bc = 0.1 * jax.random.normal(ks[1], (C_OUT,), jnp.float32)          # conv1.bias
    w1 = 0.05 * jax.random.normal(ks[2], (FLAT, HID), jnp.float32)      # fc1.weight^T
    b1 = 0.1 * jax.random.normal(ks[3], (HID,), jnp.float32)            # fc1.bias
    w2 = 0.2 * jax.random.normal(ks[4], (HID, CLASS_NUM), jnp.float32)  # fc2.weight^T
    b2 = 0.1 * jax.random.normal(ks[5], (CLASS_NUM,), jnp.float32)      # fc2.bias
    return wc, bc, w1, b1, w2, b2


if __name__ == "__main__":
    key = jax.random.PRNGKey(0)
    kx, kp = jax.random.split(key)
    params = init_params(kp)

    # Small demo batch (padded up to one 128-wide lane tile inside the wrapper).
    B = 2
    x = jax.random.normal(kx, (B, 1, L_IN), jnp.float32)
    out = jax.block_until_ready(cnn_forward(x, params))
    ref = jax.block_until_ready(ref_forward(x, params))
    assert out.shape == (B, CLASS_NUM), out.shape
    assert jnp.allclose(out, ref, atol=1e-4, rtol=1e-3), (out, ref)
    assert jnp.allclose(jnp.sum(out, axis=1), 1.0, atol=1e-5)

    # Larger batch: exercises multi-step grid (2 blocks of 256) and batch padding.
    B2 = 300
    x2 = jax.random.normal(jax.random.PRNGKey(1), (B2, 1, L_IN), jnp.float32)
    out2 = jax.block_until_ready(cnn_forward(x2, params))
    ref2 = jax.block_until_ready(ref_forward(x2, params))
    assert out2.shape == (B2, CLASS_NUM), out2.shape
    assert jnp.allclose(out2, ref2, atol=1e-4, rtol=1e-3)

    print("KERNEL_OK")
</pallas_src>

<mosaic_0001>
module attributes {stable_mosaic.version = 11 : i64} {
  func.func @cnn_kernel(%arg0: i32, %arg1: memref<42x128xf32, #tpu.memory_space<vmem>>, %arg2: memref<32x3xf32, #tpu.memory_space<vmem>>, %arg3: memref<32x1xf32, #tpu.memory_space<vmem>>, %arg4: memref<16x640xf32, #tpu.memory_space<vmem>>, %arg5: memref<16x1xf32, #tpu.memory_space<vmem>>, %arg6: memref<10x16xf32, #tpu.memory_space<vmem>>, %arg7: memref<10x1xf32, #tpu.memory_space<vmem>>, %arg8: memref<10x128xf32, #tpu.memory_space<vmem>>) attributes {dimension_semantics = [#tpu.dimension_semantics<parallel>], iteration_bounds = array<i64: 1>, scalar_prefetch = 0 : i64, scratch_operands = 0 : i64, tpu.core_type = #tpu.core_type<tc>, window_params = [{transform_indices = @transform_0, window_bounds = array<i64: 42, 128>}, {pipeline_mode = #tpu.pipeline_mode<synchronous>, transform_indices = @transform_1, window_bounds = array<i64: 32, 3>}, {pipeline_mode = #tpu.pipeline_mode<synchronous>, transform_indices = @transform_2, window_bounds = array<i64: 32, 1>}, {pipeline_mode = #tpu.pipeline_mode<synchronous>, transform_indices = @transform_3, window_bounds = array<i64: 16, 640>}, {pipeline_mode = #tpu.pipeline_mode<synchronous>, transform_indices = @transform_4, window_bounds = array<i64: 16, 1>}, {pipeline_mode = #tpu.pipeline_mode<synchronous>, transform_indices = @transform_5, window_bounds = array<i64: 10, 16>}, {pipeline_mode = #tpu.pipeline_mode<synchronous>, transform_indices = @transform_6, window_bounds = array<i64: 10, 1>}, {transform_indices = @transform_7, window_bounds = array<i64: 10, 128>}]} {
    %c0 = arith.constant 0 : index
    %c0_0 = arith.constant 0 : index
    %0 = vector.load %arg1[%c0, %c0_0] : memref<42x128xf32, #tpu.memory_space<vmem>>, vector<42x128xf32>
    %c0_1 = arith.constant 0 : index
    %c0_2 = arith.constant 0 : index
    %1 = vector.load %arg2[%c0_1, %c0_2] : memref<32x3xf32, #tpu.memory_space<vmem>>, vector<32x3xf32>
    %c0_3 = arith.constant 0 : index
    %c0_4 = arith.constant 0 : index
    %2 = vector.load %arg3[%c0_3, %c0_4] : memref<32x1xf32, #tpu.memory_space<vmem>>, vector<32x1xf32>
    %3 = vector.shape_cast %2 : vector<32x1xf32> to vector<1x32x1xf32>
    %4 = vector.extract_strided_slice %0 {offsets = [0, 0], sizes = [40, 128], strides = [1, 1]} : vector<42x128xf32> to vector<40x128xf32>
    %5 = vector.extract_strided_slice %1 {offsets = [0, 0], sizes = [32, 1], strides = [1, 1]} : vector<32x3xf32> to vector<32x1xf32>
    %6 = vector.shape_cast %5 : vector<32x1xf32> to vector<1x32x1xf32>
    %7 = vector.shape_cast %4 : vector<40x128xf32> to vector<40x1x128xf32>
    %8 = vector.broadcast %7 : vector<40x1x128xf32> to vector<40x32x128xf32>
    %9 = vector.broadcast %6 : vector<1x32x1xf32> to vector<40x32x128xf32>
    %10 = arith.mulf %8, %9 : vector<40x32x128xf32>
    %11 = vector.broadcast %3 : vector<1x32x1xf32> to vector<40x32x128xf32>
    %12 = arith.addf %11, %10 : vector<40x32x128xf32>
    %13 = vector.extract_strided_slice %0 {offsets = [1, 0], sizes = [40, 128], strides = [1, 1]} : vector<42x128xf32> to vector<40x128xf32>
    %14 = vector.extract_strided_slice %1 {offsets = [0, 1], sizes = [32, 1], strides = [1, 1]} : vector<32x3xf32> to vector<32x1xf32>
    %15 = vector.shape_cast %14 : vector<32x1xf32> to vector<1x32x1xf32>
    %16 = vector.shape_cast %13 : vector<40x128xf32> to vector<40x1x128xf32>
    %17 = vector.broadcast %16 : vector<40x1x128xf32> to vector<40x32x128xf32>
    %18 = vector.broadcast %15 : vector<1x32x1xf32> to vector<40x32x128xf32>
    %19 = arith.mulf %17, %18 : vector<40x32x128xf32>
    %20 = arith.addf %12, %19 : vector<40x32x128xf32>
    %21 = vector.extract_strided_slice %0 {offsets = [2, 0], sizes = [40, 128], strides = [1, 1]} : vector<42x128xf32> to vector<40x128xf32>
    %22 = vector.extract_strided_slice %1 {offsets = [0, 2], sizes = [32, 1], strides = [1, 1]} : vector<32x3xf32> to vector<32x1xf32>
    %23 = vector.shape_cast %22 : vector<32x1xf32> to vector<1x32x1xf32>
    %24 = vector.shape_cast %21 : vector<40x128xf32> to vector<40x1x128xf32>
    %25 = vector.broadcast %24 : vector<40x1x128xf32> to vector<40x32x128xf32>
    %26 = vector.broadcast %23 : vector<1x32x1xf32> to vector<40x32x128xf32>
    %27 = arith.mulf %25, %26 : vector<40x32x128xf32>
    %28 = arith.addf %20, %27 : vector<40x32x128xf32>
    %29 = vector.shape_cast %28 : vector<40x32x128xf32> to vector<20x2x32x128xf32>
    %30 = vector.extract_strided_slice %29 {offsets = [0, 0, 0, 0], sizes = [20, 1, 32, 128], strides = [1, 1, 1, 1]} : vector<20x2x32x128xf32> to vector<20x1x32x128xf32>
    %31 = vector.shape_cast %30 : vector<20x1x32x128xf32> to vector<20x32x128xf32>
    %32 = vector.extract_strided_slice %29 {offsets = [0, 1, 0, 0], sizes = [20, 1, 32, 128], strides = [1, 1, 1, 1]} : vector<20x2x32x128xf32> to vector<20x1x32x128xf32>
    %33 = vector.shape_cast %32 : vector<20x1x32x128xf32> to vector<20x32x128xf32>
    %34 = arith.maximumf %31, %33 : vector<20x32x128xf32>
    %cst = arith.constant 0.000000e+00 : f32
    %35 = vector.broadcast %cst : f32 to vector<20x32x128xf32>
    %36 = arith.maximumf %34, %35 : vector<20x32x128xf32>
    %37 = vector.shape_cast %36 : vector<20x32x128xf32> to vector<640x128xf32>
    %c0_5 = arith.constant 0 : index
    %c0_6 = arith.constant 0 : index
    %38 = vector.load %arg4[%c0_5, %c0_6] : memref<16x640xf32, #tpu.memory_space<vmem>>, vector<16x640xf32>
    %cst_7 = arith.constant dense<0.000000e+00> : vector<16x128xf32>
    %39 = tpu.matmul %38, %37, %cst_7 {dimension_numbers = #tpu.dot_dimension_numbers<[1], [0], [0], [1], [0, 0, 1, 1], [], []>} : vector<16x640xf32>, vector<640x128xf32>, vector<16x128xf32> -> vector<16x128xf32>
    %c0_8 = arith.constant 0 : index
    %c0_9 = arith.constant 0 : index
    %40 = vector.load %arg5[%c0_8, %c0_9] : memref<16x1xf32, #tpu.memory_space<vmem>>, vector<16x1xf32>
    %41 = vector.broadcast %40 : vector<16x1xf32> to vector<16x128xf32>
    %42 = arith.addf %39, %41 : vector<16x128xf32>
    %cst_10 = arith.constant 0.000000e+00 : f32
    %43 = vector.broadcast %cst_10 : f32 to vector<16x128xf32>
    %44 = arith.maximumf %42, %43 : vector<16x128xf32>
    %c0_11 = arith.constant 0 : index
    %c0_12 = arith.constant 0 : index
    %45 = vector.load %arg6[%c0_11, %c0_12] : memref<10x16xf32, #tpu.memory_space<vmem>>, vector<10x16xf32>
    %cst_13 = arith.constant dense<0.000000e+00> : vector<10x128xf32>
    %46 = tpu.matmul %45, %44, %cst_13 {dimension_numbers = #tpu.dot_dimension_numbers<[1], [0], [0], [1], [0, 0, 1, 1], [], []>} : vector<10x16xf32>, vector<16x128xf32>, vector<10x128xf32> -> vector<10x128xf32>
    %c0_14 = arith.constant 0 : index
    %c0_15 = arith.constant 0 : index
    %47 = vector.load %arg7[%c0_14, %c0_15] : memref<10x1xf32, #tpu.memory_space<vmem>>, vector<10x1xf32>
    %48 = vector.broadcast %47 : vector<10x1xf32> to vector<10x128xf32>
    %49 = arith.addf %46, %48 : vector<10x128xf32>
    %cst_16 = arith.constant dense<0xFF800000> : vector<128xf32>
    %50 = vector.multi_reduction <maximumf>, %49, %cst_16 [0] : vector<10x128xf32> to vector<128xf32>
    %51 = vector.shape_cast %50 : vector<128xf32> to vector<1x128xf32>
    %52 = vector.broadcast %51 : vector<1x128xf32> to vector<10x128xf32>
    %53 = arith.subf %49, %52 : vector<10x128xf32>
    %54 = math.exp %53 : vector<10x128xf32>
    %cst_17 = arith.constant dense<0.000000e+00> : vector<128xf32>
    %55 = vector.multi_reduction <add>, %54, %cst_17 [0] : vector<10x128xf32> to vector<128xf32>
    %56 = vector.shape_cast %55 : vector<128xf32> to vector<1x128xf32>
    %57 = tpu.reciprocal %56 : vector<1x128xf32> -> vector<1x128xf32>
    %58 = vector.broadcast %57 : vector<1x128xf32> to vector<10x128xf32>
    %59 = arith.mulf %54, %58 : vector<10x128xf32>
    %c0_18 = arith.constant 0 : index
    %c0_19 = arith.constant 0 : index
    %60 = vector.load %arg8[%c0_18, %c0_19] : memref<10x128xf32, #tpu.memory_space<vmem>>, vector<10x128xf32>
    tpu.vector_store %arg8[%c0_18, %c0_19], %59 {strides = array<i32>} : memref<10x128xf32, #tpu.memory_space<vmem>>, vector<10x128xf32>,
    return
  }
  func.func @transform_0(%arg0: i32) -> (i32, i32) {
    %c0_i32 = arith.constant 0 : i32
    %c0_i32_0 = arith.constant 0 : i32
    return %c0_i32, %arg0 : i32, i32
  }
  func.func @transform_1(%arg0: i32) -> (i32, i32) {
    %c0_i32 = arith.constant 0 : i32
    %c0_i32_0 = arith.constant 0 : i32
    %c0_i32_1 = arith.constant 0 : i32
    return %c0_i32, %c0_i32_0 : i32, i32
  }
  func.func @transform_2(%arg0: i32) -> (i32, i32) {
    %c0_i32 = arith.constant 0 : i32
    %c0_i32_0 = arith.constant 0 : i32
    %c0_i32_1 = arith.constant 0 : i32
    return %c0_i32, %c0_i32_0 : i32, i32
  }
  func.func @transform_3(%arg0: i32) -> (i32, i32) {
    %c0_i32 = arith.constant 0 : i32
    %c0_i32_0 = arith.constant 0 : i32
    %c0_i32_1 = arith.constant 0 : i32
    return %c0_i32, %c0_i32_0 : i32, i32
  }
  func.func @transform_4(%arg0: i32) -> (i32, i32) {
    %c0_i32 = arith.constant 0 : i32
    %c0_i32_0 = arith.constant 0 : i32
    %c0_i32_1 = arith.constant 0 : i32
    return %c0_i32, %c0_i32_0 : i32, i32
  }
  func.func @transform_5(%arg0: i32) -> (i32, i32) {
    %c0_i32 = arith.constant 0 : i32
    %c0_i32_0 = arith.constant 0 : i32
    %c0_i32_1 = arith.constant 0 : i32
    return %c0_i32, %c0_i32_0 : i32, i32
  }
  func.func @transform_6(%arg0: i32) -> (i32, i32) {
    %c0_i32 = arith.constant 0 : i32
    %c0_i32_0 = arith.constant 0 : i32
    %c0_i32_1 = arith.constant 0 : i32
    return %c0_i32, %c0_i32_0 : i32, i32
  }
  func.func @transform_7(%arg0: i32) -> (i32, i32) {
    %c0_i32 = arith.constant 0 : i32
    %c0_i32_0 = arith.constant 0 : i32
    return %c0_i32, %arg0 : i32, i32
  }
}

</mosaic_0001>

<bundles_post_ra>
// kernel: tpu_custom_call.1
= control target key start
LH: loop header
LB: loop body
LE: loop exit
PB: predicated region body
PF: predicated region fallthrough
CT: control target
= control target key end

     0   :  { %12 = vsyncpa [#allocation3], 0  ;;  %s3993_s0 = inlined_call_operand.hbm [shape: f32[42,128], index: 0, kind: input, shape index: {}]   ;;  %s3994_s1 = inlined_call_operand.vmem [shape: f32[32,3], index: 1, kind: input, shape index: {}]   ;;  %s3995_s2 = inlined_call_operand.vmem [shape: f32[32,1], index: 2, kind: input, shape index: {}]   ;;  %s3996_s3 = inlined_call_operand.vmem [shape: f32[16,640], index: 3, kind: input, shape index: {}]   ;;  %s3997_s4 = inlined_call_operand.vmem [shape: f32[16,1], index: 4, kind: input, shape index: {}]   ;;  %s3998_s5 = inlined_call_operand.vmem [shape: f32[10,16], index: 5, kind: input, shape index: {}]   ;;  %s3999_s6 = inlined_call_operand.vmem [shape: f32[10,1], index: 6, kind: input, shape index: {}]   ;;  %s4000_s7 = inlined_call_operand.hbm [shape: f32[10,128], index: 7, kind: output, shape index: {}]  }
   0x1   :  { %13 = vsyncpa [#allocation4], 0  ;;  %s2442_s24 = smov [#allocation2]   ;;  %s2394_s28 = scalar_lea.hbm %s3993_s0, 768 }
   0x2   :  { %s19_s25 = sshll.u32 %s2442_s24, 4  ;;  %p2395_p0 = scmp.ne.s32.totalorder %s3993_s0, %s2394_s28  ;;  %s20_s25 = int_to_ptr.vmem [resolvable:$true] %s19_s25 }
   0x3   :  { %p2398_p1 = scmp.lt.u32.totalorder %s2394_s28, %s3993_s0 }
   0x5   :  { %p2400_p2 = pnand %p2398_p1, %p2395_p0 }
   0x7   :  { %2403 = shalt.err (!%p2400_p2)
}
   0x8   :  { %s2404_s10 = scalar_lea.vmem %s20_s25, 768  ;;  %p2409_p4 = scmp.lt.s32.totalorder %s20_s25, %s20_s25 }
   0x9   :  { %p2405_p3 = scmp.ne.s32.totalorder %s20_s25, %s2404_s10  ;;  %p2410_p5 = scmp.lt.s32.totalorder %s2404_s10, %s2404_s10 }
   0xb   :  { %p2411_p6 = por %p2410_p5, %p2409_p4 }
   0xd   :  { %p2412_p7 = pnand %p2411_p6, %p2405_p3 }
   0xf   :  { %2415 = shalt.err (!%p2412_p7)
}
  0x10   :  { %s2443_s11 = smov 128   ;;  %s2444_s12 = smov 8  }
  0x11   :  { %25 = dma.hbm_to_vmem [thread:$0]  %s3993_s0, 768, %s20_s25, [#allocation3], %s2443_s11, %s2443_s11, %s2444_s12  }
  0x12   :  { %2438 = dma.done.wait [#allocation3], 768  }
  0x13   :  { %2439 = vsyncadd [#allocation3], 4294966528  ;;  %v2445_v0 = vmov 0   ;;  %v51_v1 = vld [vmem:[%s3995_s2] sm:$0xff]  ;;  %v52_v3 = vld [vmem:[%s3995_s2 + $0x8] sm:$0xff]  ;;  %v2446_v6 = vmov 1   ;;  %v64_v13 = vlaneseq }
  0x14   :  { %2372 = vset.pattern.permute.xlu1 %v2445_v0  ;;  %2371 = vset.pattern.permute.xlu0 %v2445_v0  ;;  %v47_v2 = vld [vmem:[%s3994_s1] sm:$0xff]  ;;  %v48_v4 = vld [vmem:[%s3994_s1 + $0x8] sm:$0xff]  ;;  %v50_v5 = vld [vmem:[%s3994_s1 + $0x18] sm:$0xff]  ;;  %v2447_v9 = vmov 2   ;;  %v2448_v11 = vmov 1966171168  }
  0x15   :  { %687 = vperm.xlu1 %2372, %v51_v1   ;;  %507 = vperm.xlu0 %2371, %v47_v2   ;;  %v53_v7 = vld [vmem:[%s3995_s2 + $0x10] sm:$0xff]  ;;  %v54_v10 = vld [vmem:[%s3995_s2 + $0x18] sm:$0xff]  ;;  %v62_v12 = vunpack.c.l.s4 %v2448_v11  ;;  %v65_v15 = vshrl.u32 %v64_v13, 7  ;;  %v41_v17 = vld [vmem:[#allocation2] sm:$0xff]  ;;  %vm1993_vm0 = vcmask 130048   ;;  %vm2075_vm1 = vcmask 1041408  }
  0x16   :  { %v49_v8 = vld [vmem:[%s3994_s1 + $0x10] sm:$0xff]  ;;  %v42_v18 = vld [vmem:[#allocation2 + $0x8] sm:$0xff]  ;;  %v44_v19 = vld [vmem:[#allocation2 + $0x18] sm:$0xff]  ;;  %v60_v22 = vcombine.high %v41_v17, %v41_v17 }
  0x17   :  { %v63_v14 = vunpack.c.0.s8 %v62_v12  ;;  %v109_v25 = vcombine.high %v42_v18, %v42_v18  ;;  %v43_v28 = vld [vmem:[#allocation2 + $0x10] sm:$0xff]  ;;  %v207_v30 = vcombine.high %v44_v19, %v44_v19  ;;  %v2536_v31 = vsub.s32 0, %v65_v15 }
  0x18   :  { %v158_v36 = vcombine.high %v43_v28, %v43_v28 }
  0x19   :  { %692 = vperm.xlu1 %2372, %v52_v3   ;;  %512 = vperm.xlu0 %2371, %v48_v4   ;;  %v2529_v16 = vsub.s32 %v63_v14, %v65_v15  ;;  %4048 = vst [vmem:[#allocation9_spill] sm:$0xff] %v2536_v31 }
  0x1b   :  { %4047 = vst [vmem:[#allocation8_spill] sm:$0xff] %v2529_v16  ;;  %v116_v20 = vrot.slane %v42_v18, %v2529_v16  ;;  %v214_v21 = vrot.slane %v44_v19, %v2529_v16  ;;  %v67_v26 = vrot.slane %v41_v17, %v2529_v16  ;;  %v74_v27 = vrot.slane %v60_v22, %v2529_v16 }
  0x1c   :  { %v165_v33 = vrot.slane %v43_v28, %v2529_v16  ;;  %v123_v39 = vrot.slane %v109_v25, %v2529_v16  ;;  %v221_v41 = vrot.slane %v207_v30, %v2529_v16  ;;  %v172_v49 = vrot.slane %v158_v36, %v2529_v16 }
  0x1d   :  { %2373 = vset.pattern.permute.xlu1 %v2446_v6  ;;  %522 = vperm.xlu0 %2371, %v50_v5   ;;  %v124_v23 = vcombine.high %v116_v20, %v116_v20  ;;  %v222_v24 = vcombine.high %v214_v21, %v214_v21  ;;  %v132_v29 = vrot.slane %v116_v20, %v2529_v16 }
  0x1e   :  { %890 = vperm.xlu1 %2373, %v48_v4   ;;  %v230_v32 = vrot.slane %v214_v21, %v2529_v16  ;;  %v75_v37 = vcombine.high %v67_v26, %v67_v26  ;;  %v76_v38 = vcombine.high %v74_v27, %v74_v27  ;;  %v83_v44 = vrot.slane %v67_v26, %v2529_v16 }
  0x1f   :  { %v146_v34 = vrot.slane %v124_v23, %v2529_v16  ;;  %v244_v35 = vrot.slane %v222_v24, %v2529_v16  ;;  %v154_v40 = vcombine.high %v132_v29, %v132_v29  ;;  %v2545_v42 = vrot.slane %v132_v29, %v2536_v31 }
  0x20   :  { %v252_v43 = vcombine.high %v230_v32, %v230_v32  ;;  %v173_v45 = vcombine.high %v165_v33, %v165_v33  ;;  %v90_v48 = vrot.slane %v74_v27, %v2529_v16  ;;  %v2551_v50 = vrot.slane %v230_v32, %v2536_v31 }
  0x21   :  { %697 = vperm.xlu0 %2371, %v53_v7   ;;  %4049 = vst [vmem:[#allocation10_spill] sm:$0xff] %v2545_v42  ;;  %v156_v46 = vcombine.high %v146_v34, %v146_v34  ;;  %v254_v47 = vcombine.high %v244_v35, %v244_v35  ;;  %v97_v51 = vrot.slane %v75_v37, %v2529_v16 }
  0x22   :  { %2374 = vset.pattern.permute.xlu1 %v2445_v0  ;;  %4050 = vst [vmem:[#allocation11_spill] sm:$0xff] %v2551_v50  ;;  %v104_v52 = vrot.slane %v76_v38, %v2529_v16  ;;  %v125_v53 = vcombine.high %v123_v39, %v123_v39  ;;  %v2556_v54 = vrot.slane %v146_v34, %v2536_v31 }
  0x23   :  { %517 = vperm.xlu1 %2374, %v49_v8   ;;  %v2559_v55 = vrot.slane %v154_v40, %v2536_v31  ;;  %v2562_v56 = vrot.slane %v244_v35, %v2536_v31  ;;  %v223_v57 = vcombine.high %v221_v41, %v221_v41  ;;  %v2565_v58 = vrot.slane %v252_v43, %v2536_v31 }
  0x24   :  { %v105_v59 = vcombine.high %v83_v44, %v83_v44  ;;  %v181_v60 = vrot.slane %v165_v33, %v2529_v16  ;;  %v195_v61 = vrot.slane %v173_v45, %v2529_v16  ;;  %v2570_v62 = vrot.slane %v156_v46, %v2536_v31 }
  0x25   :  { %2376 = vset.pattern.permute.xlu0 %v2446_v6  ;;  %v2573_v63 = vrot.slane %v254_v47, %v2536_v31  ;;  %v174_v1 = vcombine.high %v172_v49, %v172_v49  ;;  %v108_v3 = vcombine.high %v104_v52, %v104_v52  ;;  %v2581_v7 = vrot.slane %v90_v48, %v2536_v31 }
  0x26   :  { %886 = vperm.xlu0 %2376, %v47_v2   ;;  %v2589_v11 = vrot.slane %v105_v59, %v2536_v31  ;;  %v203_v12 = vcombine.high %v181_v60, %v181_v60  ;;  %v205_v13 = vcombine.high %v195_v61, %v195_v61  ;;  %v2592_v14 = vrot.slane %v104_v52, %v2536_v31 }
  0x27   :  { %2375 = vset.pattern.permute.xlu1 %v2447_v9  ;;  %4051 = vst [vmem:[#allocation12_spill] sm:$0xff] %v2581_v7  ;;  %v188_v17 = vrot.slane %v172_v49, %v2529_v16  ;;  %v202_v18 = vrot.slane %v174_v1, %v2529_v16  ;;  %v2603_v20 = vrot.slane %v108_v3, %v2536_v31 }
  0x28   :  { %1235 = vperm.xlu1 %2375, %v47_v2   ;;  %v107_v2 = vcombine.high %v97_v51, %v97_v51  ;;  %4052 = vst [vmem:[#allocation13_spill] sm:$0xff] %v2592_v14  ;;  %v2606_v23 = vrot.slane %v181_v60, %v2536_v31  ;;  %v2609_v24 = vrot.slane %v195_v61, %v2536_v31 }
  0x29   :  { %4055 = vst [vmem:[#allocation16_spill] sm:$0xff] %v2603_v20  ;;  %v2612_v27 = vrot.slane %v203_v12, %v2536_v31  ;;  %v2615_v28 = vrot.slane %v205_v13, %v2536_v31  ;;  %v204_v34 = vcombine.high %v188_v17, %v188_v17  ;;  %v206_v35 = vcombine.high %v202_v18, %v202_v18 }
  0x2a   :  { %894 = vperm.xlu0 %2376, %v49_v8   ;;  %v2600_v19 = vrot.slane %v107_v2, %v2536_v31  ;;  %4056 = vst [vmem:[#allocation17_spill] sm:$0xff] %v2606_v23  ;;  %4057 = vst [vmem:[#allocation18_spill] sm:$0xff] %v2609_v24  ;;  %v2630_v36 = vrot.slane %v188_v17, %v2536_v31  ;;  %v2633_v37 = vrot.slane %v202_v18, %v2536_v31 }
  0x2b   :  { %v2652_v45 = vrot.slane %v204_v34, %v2536_v31  ;;  %v2655_v46 = vrot.slane %v206_v35, %v2536_v31 }
  0x2c   :  { %1239 = vperm.xlu1 %2375, %v48_v4   ;;  %v139_v4 = vrot.slane %v123_v39, %v2529_v16  ;;  %4054 = vst [vmem:[#allocation15_spill] sm:$0xff] %v2600_v19  ;;  %4062 = vst [vmem:[#allocation23_spill] sm:$0xff] %v2630_v36 }
  0x2d   :  { %4063 = vst [vmem:[#allocation24_spill] sm:$0xff] %v2633_v37  ;;  %4070 = vst [vmem:[#allocation31_spill] sm:$0xff] %v2652_v45 }
  0x2e   :  { %2380 = vset.pattern.permute.xlu0 %v2447_v9  ;;  %v155_v21 = vcombine.high %v139_v4, %v139_v4  ;;  %v2618_v29 = vrot.slane %v139_v4, %v2536_v31  ;;  %4071 = vst [vmem:[#allocation32_spill] sm:$0xff] %v2655_v46 }
  0x2f   :  { %1247 = vperm.xlu0 %2380, %v50_v5  }
  0x30   :  { %2377 = vset.pattern.permute.xlu1 %v2445_v0  ;;  %4058 = vst [vmem:[#allocation19_spill] sm:$0xff] %v2618_v29  ;;  %v2636_v38 = vrot.slane %v155_v21, %v2536_v31 }
  0x31   :  { %702 = vperm.xlu1 %2377, %v54_v10   ;;  %v2586_v10 = vrot.slane %v97_v51, %v2536_v31 }
  0x32   :  { %4064 = vst [vmem:[#allocation25_spill] sm:$0xff] %v2636_v38 }
  0x33   :  { %2382 = vset.pattern.permute.xlu0 %v2445_v0 }
  0x35   :  { %2378 = vset.pattern.permute.xlu1 %v2446_v6  ;;  %v2578_v6 = vrot.slane %v83_v44, %v2536_v31 }
  0x36   :  { %898 = vperm.xlu1 %2378, %v50_v5   ;;  %v153_v5 = vrot.slane %v125_v53, %v2529_v16 }
  0x38   :  { %v157_v22 = vcombine.high %v153_v5, %v153_v5  ;;  %v2621_v30 = vrot.slane %v153_v5, %v2536_v31 }
  0x3a   :  { %2379 = vset.pattern.permute.xlu1 %v2447_v9  ;;  %v251_v9 = vrot.slane %v223_v57, %v2529_v16  ;;  %4059 = vst [vmem:[#allocation20_spill] sm:$0xff] %v2621_v30  ;;  %v2639_v39 = vrot.slane %v157_v22, %v2536_v31 }
  0x3b   :  { %1243 = vperm.xlu1 %2379, %v49_v8   ;;  %v237_v8 = vrot.slane %v221_v41, %v2529_v16 }
  0x3c   :  { %v255_v26 = vcombine.high %v251_v9, %v251_v9  ;;  %v2627_v33 = vrot.slane %v251_v9, %v2536_v31  ;;  %4065 = vst [vmem:[#allocation26_spill] sm:$0xff] %v2639_v39 }
  0x3d   :  { %v253_v25 = vcombine.high %v237_v8, %v237_v8  ;;  %v2624_v32 = vrot.slane %v237_v8, %v2536_v31 }
  0x3e   :  { %4061 = vst [vmem:[#allocation22_spill] sm:$0xff] %v2627_v33  ;;  %v2649_v44 = vrot.slane %v255_v26, %v2536_v31 }
  0x3f   :  { %2381 = vset.pattern.permute.xlu1 %v2445_v0  ;;  %v106_v0 = vcombine.high %v90_v48, %v90_v48  ;;  %4060 = vst [vmem:[#allocation21_spill] sm:$0xff] %v2624_v32  ;;  %v2646_v43 = vrot.slane %v253_v25, %v2536_v31 }
  0x40   :  { %4069 = vst [vmem:[#allocation30_spill] sm:$0xff] %v2649_v44 }
  0x41   :  { %v2595_v15 = vrot.slane %v106_v0, %v2536_v31  ;;  %4068 = vst [vmem:[#allocation29_spill] sm:$0xff] %v2646_v43 }
  0x43   :  { %4053 = vst [vmem:[#allocation14_spill] sm:$0xff] %v2595_v15 }
  0x94   :  { %v2641_v40 = vpop.permute.xlu1 %687  ;;  %v2643_v41 = vpop.permute.xlu0 %507 }
  0x95   :  { %4066 = vst [vmem:[#allocation27_spill] sm:$0xff] %v2641_v40  ;;  %4067 = vst [vmem:[#allocation28_spill] sm:$0xff] %v2643_v41  ;;  %v557_v47 = vmul.f32 %v2643_v41, %v2545_v42  ;;  %v561_v48 = vmul.f32 %v2643_v41, %v2556_v54  ;;  %v621_v49 = vmul.f32 %v2643_v41, %v2551_v50 }
  0x96   :  { %v625_v51 = vmul.f32 %v2643_v41, %v2562_v56  ;;  %v525_v52 = vmul.f32 %v2643_v41, %v2578_v6  ;;  %v529_v53 = vmul.f32 %v2643_v41, %v2586_v10  ;;  %v589_v57 = vmul.f32 %v2643_v41, %v2606_v23 }
  0x97   :  { %v593_v59 = vmul.f32 %v2643_v41, %v2609_v24  ;;  %v2674_v60 = vadd.f32 %v2641_v40, %v557_v47  ;;  %v2677_v61 = vadd.f32 %v2641_v40, %v561_v48  ;;  %v2680_v0 = vadd.f32 %v2641_v40, %v621_v49 }
  0x98   :  { %v2683_v1 = vadd.f32 %v2641_v40, %v625_v51  ;;  %v2685_v2 = vpop.permute.xlu1 %692  ;;  %v2687_v3 = vpop.permute.xlu0 %512  ;;  %v2690_v4 = vadd.f32 %v2641_v40, %v525_v52  ;;  %v2693_v5 = vadd.f32 %v2641_v40, %v529_v53  ;;  %v2696_v8 = vadd.f32 %v2641_v40, %v589_v57 }
  0x99   :  { %4072 = vst [vmem:[#allocation33_spill] sm:$0xff] %v2685_v2  ;;  %4073 = vst [vmem:[#allocation34_spill] sm:$0xff] %v2687_v3  ;;  %v2699_v9 = vadd.f32 %v2641_v40, %v593_v59  ;;  %v558_v12 = vmul.f32 %v2687_v3, %v2545_v42  ;;  %v562_v13 = vmul.f32 %v2687_v3, %v2556_v54 }
  0x9a   :  { %v622_v17 = vmul.f32 %v2687_v3, %v2551_v50  ;;  %v626_v18 = vmul.f32 %v2687_v3, %v2562_v56  ;;  %v526_v21 = vmul.f32 %v2687_v3, %v2578_v6  ;;  %v530_v22 = vmul.f32 %v2687_v3, %v2586_v10 }
  0x9b   :  { %v590_v25 = vmul.f32 %v2687_v3, %v2606_v23  ;;  %v594_v26 = vmul.f32 %v2687_v3, %v2609_v24  ;;  %v738_v34 = vadd.f32 %v2685_v2, %v558_v12  ;;  %v742_v35 = vadd.f32 %v2685_v2, %v562_v13 }
  0x9c   :  { %v802_v47 = vadd.f32 %v2685_v2, %v622_v17  ;;  %v806_v48 = vadd.f32 %v2685_v2, %v626_v18  ;;  %v2721_v49 = vpop.permute.xlu0 %522  ;;  %v706_v51 = vadd.f32 %v2685_v2, %v526_v21  ;;  %v710_v52 = vadd.f32 %v2685_v2, %v530_v22 }
  0x9d   :  { %4074 = vst [vmem:[#allocation35_spill] sm:$0xff] %v2721_v49  ;;  %v770_v53 = vadd.f32 %v2685_v2, %v590_v25  ;;  %v774_v57 = vadd.f32 %v2685_v2, %v594_v26  ;;  %v2727_v59 = vpop.permute.xlu1 %890  ;;  %v2731_v12 = vmul.f32 %v2721_v49, %v2545_v42  ;;  %v2735_v13 = vmul.f32 %v2721_v49, %v2556_v54 }
  0x9e   :  { %4075 = vst [vmem:[#allocation36_spill] sm:$0xff] %v2727_v59  ;;  %v2739_v17 = vmul.f32 %v2721_v49, %v2551_v50  ;;  %v2743_v18 = vmul.f32 %v2721_v49, %v2562_v56  ;;  %v934_v21 = vmul.f32 %v2727_v59, %v2556_v54  ;;  %v938_v22 = vmul.f32 %v2727_v59, %v2559_v55 }
  0x9f   :  { %v998_v25 = vmul.f32 %v2727_v59, %v2562_v56  ;;  %v1002_v26 = vmul.f32 %v2727_v59, %v2565_v58  ;;  %v902_v31 = vmul.f32 %v2727_v59, %v2586_v10  ;;  %v906_v16 = vmul.f32 %v2727_v59, %v2589_v11 }
  0xa0   :  { %v966_v46 = vmul.f32 %v2727_v59, %v2609_v24  ;;  %v970_v45 = vmul.f32 %v2727_v59, %v2612_v27  ;;  %v2761_v20 = vpop.permute.xlu0 %697  ;;  %v1094_v15 = vadd.f32 %v934_v21, %v738_v34  ;;  %v1098_v44 = vadd.f32 %v938_v22, %v742_v35 }
  0xa1   :  { %v1158_v43 = vadd.f32 %v998_v25, %v802_v47  ;;  %v1162_v39 = vadd.f32 %v1002_v26, %v806_v48  ;;  %v2763_v38 = vadd.f32 %v902_v31, %v706_v51  ;;  %v2765_v37 = vadd.f32 %v906_v16, %v710_v52 }
  0xa2   :  { %v2767_v36 = vadd.f32 %v966_v46, %v770_v53  ;;  %v2769_v14 = vadd.f32 %v970_v45, %v774_v57  ;;  %v2771_v7 = vpop.permute.xlu1 %517  ;;  %v2775_v33 = vmul.f32 %v2721_v49, %v2578_v6  ;;  %v2779_v34 = vmul.f32 %v2721_v49, %v2586_v10 }
  0xa3   :  { %4076 = vst [vmem:[#allocation37_spill] sm:$0xff] %v2771_v7  ;;  %v2783_v31 = vmul.f32 %v2721_v49, %v2606_v23  ;;  %v2787_v16 = vmul.f32 %v2721_v49, %v2609_v24  ;;  %v559_v45 = vmul.f32 %v2771_v7, %v2545_v42  ;;  %v563_v46 = vmul.f32 %v2771_v7, %v2556_v54 }
  0xa4   :  { %v623_v35 = vmul.f32 %v2771_v7, %v2551_v50  ;;  %v627_v47 = vmul.f32 %v2771_v7, %v2562_v56  ;;  %v2799_v48 = vmul.f32 %v2771_v7, %v2578_v6  ;;  %v2803_v51 = vmul.f32 %v2771_v7, %v2586_v10 }
  0xa5   :  { %4077 = vst [vmem:[#allocation38_spill] sm:$0xff] %v2783_v31  ;;  %4078 = vst [vmem:[#allocation39_spill] sm:$0xff] %v2787_v16  ;;  %v2807_v52 = vmul.f32 %v2771_v7, %v2606_v23  ;;  %v2811_v53 = vmul.f32 %v2771_v7, %v2609_v24  ;;  %v2813_v57 = vpop.permute.xlu0 %886  ;;  %v2816_v21 = vadd.f32 %v2761_v20, %v559_v45 }
  0xa6   :  { %4081 = vst [vmem:[#allocation42_spill] sm:$0xff] %v2813_v57  ;;  %v2819_v6 = vadd.f32 %v2761_v20, %v563_v46  ;;  %v2822_v22 = vadd.f32 %v2761_v20, %v623_v35  ;;  %v2825_v25 = vadd.f32 %v2761_v20, %v627_v47  ;;  %v933_v26 = vmul.f32 %v2813_v57, %v2556_v54 }
  0xa7   :  { %4079 = vst [vmem:[#allocation40_spill] sm:$0xff] %v2807_v52  ;;  %4080 = vst [vmem:[#allocation41_spill] sm:$0xff] %v2811_v53  ;;  %v937_v50 = vmul.f32 %v2813_v57, %v2559_v55  ;;  %v997_v42 = vmul.f32 %v2813_v57, %v2562_v56  ;;  %v1001_v45 = vmul.f32 %v2813_v57, %v2565_v58  ;;  %v2835_v46 = vpop.permute.xlu1 %1235 }
  0xa8   :  { %v901_v35 = vmul.f32 %v2813_v57, %v2586_v10  ;;  %v905_v47 = vmul.f32 %v2813_v57, %v2589_v11  ;;  %v965_v23 = vmul.f32 %v2813_v57, %v2609_v24  ;;  %v969_v49 = vmul.f32 %v2813_v57, %v2612_v27 }
  0xa9   :  { %v1093_v7 = vadd.f32 %v933_v26, %v2674_v60  ;;  %v1097_v32 = vadd.f32 %v937_v50, %v2677_v61  ;;  %v1282_v30 = vmul.f32 %v2835_v46, %v2559_v55  ;;  %v1286_v29 = vmul.f32 %v2835_v46, %v2570_v62  ;;  %v2878_v16 = vpop.permute.xlu0 %894 }
  0xaa   :  { %v1157_v59 = vadd.f32 %v997_v42, %v2680_v0  ;;  %v1161_v2 = vadd.f32 %v1001_v45, %v2683_v1  ;;  %v1346_v40 = vmul.f32 %v2835_v46, %v2565_v58  ;;  %v1350_v57 = vmul.f32 %v2835_v46, %v2573_v63 }
  0xab   :  { %v1442_v3 = vadd.f32 %v1282_v30, %v1093_v7  ;;  %v1446_v60 = vadd.f32 %v1286_v29, %v1097_v32  ;;  %v1061_v50 = vadd.f32 %v901_v35, %v2690_v4  ;;  %v1065_v61 = vadd.f32 %v905_v47, %v2693_v5  ;;  %v2859_v26 = vpop.permute.xlu1 %1239 }
  0xac   :  { %v1506_v41 = vadd.f32 %v1346_v40, %v1157_v59  ;;  %v1510_v24 = vadd.f32 %v1350_v57, %v1161_v2  ;;  %v1250_v42 = vmul.f32 %v2835_v46, %v2589_v11  ;;  %v1254_v0 = vmul.f32 %v2835_v46, %v2600_v19 }
  0xad   :  { %v1283_v1 = vmul.f32 %v2859_v26, %v2559_v55  ;;  %v1287_v7 = vmul.f32 %v2859_v26, %v2570_v62  ;;  %v1586_v29 = vmax.f32 %v1442_v3, %v1446_v60  ;;  %v1347_v30 = vmul.f32 %v2859_v26, %v2565_v58 }
  0xae   :  { %v1351_v32 = vmul.f32 %v2859_v26, %v2573_v63  ;;  %v1618_v40 = vmax.f32 %v1506_v41, %v1510_v24  ;;  %v1251_v2 = vmul.f32 %v2859_v26, %v2589_v11  ;;  %v1255_v4 = vmul.f32 %v2859_v26, %v2600_v19 }
  0xaf   :  { %v1443_v5 = vadd.f32 %v1283_v1, %v1094_v15  ;;  %v1447_v59 = vadd.f32 %v1287_v7, %v1098_v44  ;;  %v1666_v57 = vmax.f32 %v1586_v29, 0.0  ;;  %v1507_v45 = vadd.f32 %v1347_v30, %v1158_v43 }
  0xb0   :  { %v1511_v35 = vadd.f32 %v1351_v32, %v1162_v39  ;;  %v1698_v47 = vmax.f32 %v1618_v40, 0.0  ;;  %v1410_v3 = vadd.f32 %v1250_v42, %v1061_v50  ;;  %v1411_v60 = vadd.f32 %v1251_v2, %v2763_v38  ;;  %v2880_v53 = vpop.permute.xlu1 %702 }
  0xb1   :  { %v1587_v24 = vmax.f32 %v1443_v5, %v1447_v59  ;;  %v1414_v41 = vadd.f32 %v1254_v0, %v1065_v61  ;;  %v1415_v31 = vadd.f32 %v1255_v4, %v2765_v37  ;;  %v1125_v52 = vadd.f32 %v965_v23, %v2696_v8 }
  0xb2   :  { %v1619_v19 = vmax.f32 %v1507_v45, %v1511_v35  ;;  %v1129_v15 = vadd.f32 %v969_v49, %v2699_v9  ;;  %v1314_v39 = vmul.f32 %v2835_v46, %v2612_v27  ;;  %v1315_v43 = vmul.f32 %v2859_v26, %v2612_v27  ;;  %v2894_v49 = vpop.permute.xlu0 %1247 }
  0xb3   :  { %v1667_v38 = vmax.f32 %v1587_v24, 0.0  ;;  %v1570_v44 = vmax.f32 %v1410_v3, %v1414_v41  ;;  %v1571_v50 = vmax.f32 %v1411_v60, %v1415_v31  ;;  %v1318_v42 = vmul.f32 %v2835_v46, %v2615_v28 }
  0xb4   :  { %v1699_v61 = vmax.f32 %v1619_v19, 0.0  ;;  %v1319_v37 = vmul.f32 %v2859_v26, %v2615_v28  ;;  %v1474_v23 = vadd.f32 %v1314_v39, %v1125_v52  ;;  %v1475_v8 = vadd.f32 %v1315_v43, %v2767_v36 }
  0xb5   :  { %v2263_v9 = vpack.c.bf16 %v1667_v38, %v1666_v57  ;;  %v1650_v0 = vmax.f32 %v1570_v44, 0.0  ;;  %v1651_v1 = vmax.f32 %v1571_v50, 0.0  ;;  %v1478_v7 = vadd.f32 %v1318_v42, %v1129_v15  ;;  %v2896_v29 = vpop.permute.xlu1 %898 }
  0xb6   :  { %v2295_v30 = vpack.c.bf16 %v1699_v61, %v1698_v47  ;;  %v1479_v31 = vadd.f32 %v1319_v37, %v2769_v14  ;;  %v740_v19 = vadd.f32 %v2880_v53, %v2731_v12  ;;  %v744_v32 = vadd.f32 %v2880_v53, %v2735_v13 }
  0xb7   :  { %2264 = vmatprep.subr.bf16.mxu0 %v2263_v9  ;;  %v2265_v52 = vpack.c.bf16 %v1651_v1, %v1650_v0  ;;  %v1602_v36 = vmax.f32 %v1474_v23, %v1478_v7  ;;  %v935_v40 = vmul.f32 %v2878_v16, %v2556_v54  ;;  %v936_v2 = vmul.f32 %v2896_v29, %v2556_v54 }
  0xb8   :  { %2296 = vmatprep.subr.bf16.mxu1 %v2295_v30  ;;  %v1603_v4 = vmax.f32 %v1475_v8, %v1479_v31  ;;  %v939_v14 = vmul.f32 %v2878_v16, %v2559_v55  ;;  %v940_v12 = vmul.f32 %v2896_v29, %v2559_v55  ;;  %v1285_v13 = vmul.f32 %v2894_v49, %v2559_v55 }
  0xb9   :  { %2266 = vmatpush3.bf16.msra.mxu0 %v2265_v52  ;;  %v1682_v5 = vmax.f32 %v1602_v36, 0.0  ;;  %v1095_v59 = vadd.f32 %v935_v40, %v2816_v21  ;;  %v1096_v57 = vadd.f32 %v936_v2, %v740_v19  ;;  %v1289_v45 = vmul.f32 %v2894_v49, %v2570_v62 }
  0xba   :  { %v1683_v35 = vmax.f32 %v1603_v4, 0.0  ;;  %v1099_v47 = vadd.f32 %v939_v14, %v2819_v6  ;;  %v1100_v3 = vadd.f32 %v940_v12, %v744_v32  ;;  %v804_v60 = vadd.f32 %v2880_v53, %v2739_v17  ;;  %v2919_v24 = vpop.permute.xlu1 %1243 }
  0xbb   :  { %v1445_v41 = vadd.f32 %v1285_v13, %v1096_v57  ;;  %v808_v15 = vadd.f32 %v2880_v53, %v2743_v18  ;;  %v999_v21 = vmul.f32 %v2878_v16, %v2562_v56  ;;  %v1000_v39 = vmul.f32 %v2896_v29, %v2562_v56 }
  0xbc   :  { %v2297_v43 = vpack.c.bf16 %v1683_v35, %v1682_v5  ;;  %v1284_v6 = vmul.f32 %v2919_v24, %v2559_v55  ;;  %v1288_v38 = vmul.f32 %v2919_v24, %v2570_v62  ;;  %v1449_v17 = vadd.f32 %v1289_v45, %v1100_v3 }
  0xbd   :  { %v1003_v44 = vmul.f32 %v2878_v16, %v2565_v58  ;;  %v1004_v18 = vmul.f32 %v2896_v29, %v2565_v58  ;;  %v1159_v50 = vadd.f32 %v999_v21, %v2822_v22  ;;  %v1160_v42 = vadd.f32 %v1000_v39, %v804_v60 }
  0xbe   :  { %2298 = vmatpush3.bf16.msra.mxu1 %v2297_v43  ;;  %v1444_v61 = vadd.f32 %v1284_v6, %v1095_v59  ;;  %v1448_v37 = vadd.f32 %v1288_v38, %v1099_v47  ;;  %v1589_v23 = vmax.f32 %v1445_v41, %v1449_v17  ;;  %v1348_v8 = vmul.f32 %v2919_v24, %v2565_v58  ;;  %v4082_v41 = vld [vmem:[#allocation15_spill] sm:$0xff]  ;;  %v4083_v43 = vld [vmem:[#allocation40_spill] sm:$0xff]  ;;  %v4084_v38 = vld [vmem:[#allocation38_spill] sm:$0xff] }
  0xbf   :  { %v1163_v9 = vadd.f32 %v1003_v44, %v2825_v25  ;;  %v1164_v0 = vadd.f32 %v1004_v18, %v808_v15  ;;  %v1349_v1 = vmul.f32 %v2894_v49, %v2565_v58  ;;  %v1352_v7 = vmul.f32 %v2919_v24, %v2573_v63 }
  0xc0   :  { %v1588_v30 = vmax.f32 %v1444_v61, %v1448_v37  ;;  %v1669_v31 = vmax.f32 %v1589_v23, 0.0  ;;  %v1353_v22 = vmul.f32 %v2894_v49, %v2573_v63  ;;  %v1508_v19 = vadd.f32 %v1348_v8, %v1159_v50  ;;  %v4086_v23 = vld [vmem:[#allocation39_spill] sm:$0xff] }
  0xc1   :  { %v1509_v32 = vadd.f32 %v1349_v1, %v1160_v42  ;;  %v1512_v52 = vadd.f32 %v1352_v7, %v1163_v9  ;;  %v707_v36 = vadd.f32 %v2761_v20, %v2799_v48  ;;  %v708_v25 = vadd.f32 %v2880_v53, %v2775_v33  ;;  %v4085_v42 = vld [vmem:[#allocation41_spill] sm:$0xff]  ;;  %v4087_v9 = vld [vmem:[#allocation18_spill] sm:$0xff] }
  0xc2   :  { %v1668_v40 = vmax.f32 %v1588_v30, 0.0  ;;  %v1513_v2 = vadd.f32 %v1353_v22, %v1164_v0  ;;  %v711_v4 = vadd.f32 %v2761_v20, %v2803_v51  ;;  %v712_v14 = vadd.f32 %v2880_v53, %v2779_v34 }
  0xc3   :  { %v1620_v12 = vmax.f32 %v1508_v19, %v1512_v52  ;;  %v903_v13 = vmul.f32 %v2878_v16, %v2586_v10  ;;  %v904_v5 = vmul.f32 %v2896_v29, %v2586_v10  ;;  %v907_v48 = vmul.f32 %v2878_v16, %v2589_v11 }
  0xc4   :  { %v2267_v59 = vpack.c.bf16 %v1669_v31, %v1668_v40  ;;  %v1621_v33 = vmax.f32 %v1509_v32, %v1513_v2  ;;  %v908_v57 = vmul.f32 %v2896_v29, %v2589_v11  ;;  %v1252_v51 = vmul.f32 %v2919_v24, %v2589_v11 }
  0xc5   :  { %v1700_v45 = vmax.f32 %v1620_v12, 0.0  ;;  %v1063_v34 = vadd.f32 %v903_v13, %v707_v36  ;;  %v1064_v35 = vadd.f32 %v904_v5, %v708_v25  ;;  %v1067_v47 = vadd.f32 %v907_v48, %v711_v4 }
  0xc6   :  { %2268 = vmatprep.subr.bf16.mxu0 %v2267_v59  ;;  %v1701_v3 = vmax.f32 %v1621_v33, 0.0  ;;  %v1068_v60 = vadd.f32 %v908_v57, %v712_v14  ;;  %v1253_v10 = vmul.f32 %v2894_v49, %v2589_v11  ;;  %v1256_v15 = vmul.f32 %v2919_v24, %v4082_v41  ;;  %v4088_v59 = vld [vmem:[#allocation28_spill] sm:$0xff]  ;;  %v4089_v57 = vld [vmem:[#allocation34_spill] sm:$0xff] }
  0xc7   :  { %v1257_v21 = vmul.f32 %v2894_v49, %v4082_v41  ;;  %v1412_v39 = vadd.f32 %v1252_v51, %v1063_v34  ;;  %v771_v6 = vadd.f32 %v2761_v20, %v4083_v43  ;;  %v772_v17 = vadd.f32 %v2880_v53, %v4084_v38 }
  0xc8   :  { %v2299_v44 = vpack.c.bf16 %v1701_v3, %v1700_v45  ;;  %v1413_v18 = vadd.f32 %v1253_v10, %v1064_v35  ;;  %v1416_v50 = vadd.f32 %v1256_v15, %v1067_v47  ;;  %v775_v61 = vadd.f32 %v2761_v20, %v4085_v42  ;;  %v4090_v3 = vld [vmem:[#allocation42_spill] sm:$0xff]  ;;  %v4091_v15 = vld [vmem:[#allocation27_spill] sm:$0xff] }
  0xc9   :  { %v1417_v37 = vadd.f32 %v1257_v21, %v1068_v60  ;;  %v776_v8 = vadd.f32 %v2880_v53, %v4086_v23  ;;  %v967_v0 = vmul.f32 %v2878_v16, %v4087_v9  ;;  %v968_v1 = vmul.f32 %v2896_v29, %v4087_v9 }
  0xca   :  { %2300 = vmatprep.subr.bf16.mxu1 %v2299_v44  ;;  %v1572_v7 = vmax.f32 %v1412_v39, %v1416_v50  ;;  %v971_v30 = vmul.f32 %v2878_v16, %v2612_v27  ;;  %v972_v31 = vmul.f32 %v2896_v29, %v2612_v27  ;;  %v1316_v22 = vmul.f32 %v2919_v24, %v2612_v27  ;;  %v4092_v39 = vld [vmem:[#allocation33_spill] sm:$0xff]  ;;  %v4093_v44 = vld [vmem:[#allocation36_spill] sm:$0xff]  ;;  %v4094_v50 = vld [vmem:[#allocation19_spill] sm:$0xff] }
  0xcb   :  { %v1573_v19 = vmax.f32 %v1413_v18, %v1417_v37  ;;  %v1127_v32 = vadd.f32 %v967_v0, %v771_v6  ;;  %v1128_v52 = vadd.f32 %v968_v1, %v772_v17  ;;  %v1317_v36 = vmul.f32 %v2894_v49, %v2612_v27 }
  0xcc   :  { %v1652_v25 = vmax.f32 %v1572_v7, 0.0  ;;  %v1131_v40 = vadd.f32 %v971_v30, %v775_v61  ;;  %v1132_v2 = vadd.f32 %v972_v31, %v776_v8  ;;  %v1320_v4 = vmul.f32 %v2919_v24, %v2615_v28 }
  0xcd   :  { %v1653_v14 = vmax.f32 %v1573_v19, 0.0  ;;  %v1321_v12 = vmul.f32 %v2894_v49, %v2615_v28  ;;  %v1476_v13 = vadd.f32 %v1316_v22, %v1127_v32  ;;  %v1477_v5 = vadd.f32 %v1317_v36, %v1128_v52  ;;  %v4095_v22 = vld [vmem:[#allocation20_spill] sm:$0xff] }
  0xce   :  { %v1480_v48 = vadd.f32 %v1320_v4, %v1131_v40  ;;  %v565_v33 = vmul.f32 %v4088_v59, %v2559_v55  ;;  %v566_v51 = vmul.f32 %v4089_v57, %v2559_v55  ;;  %v569_v45 = vmul.f32 %v4088_v59, %v2570_v62 }
  0xcf   :  { %v2269_v34 = vpack.c.bf16 %v1653_v14, %v1652_v25  ;;  %v1481_v35 = vadd.f32 %v1321_v12, %v1132_v2  ;;  %v570_v47 = vmul.f32 %v4089_v57, %v2570_v62  ;;  %v941_v60 = vmul.f32 %v4090_v3, %v2570_v62 }
  0xd0   :  { %v1604_v10 = vmax.f32 %v1476_v13, %v1480_v48  ;;  %v745_v21 = vadd.f32 %v4091_v15, %v565_v33  ;;  %v746_v43 = vadd.f32 %v4092_v39, %v566_v51  ;;  %v749_v6 = vadd.f32 %v4091_v15, %v569_v45 }
  0xd1   :  { %2270 = vmatpush3.bf16.msra.mxu0 %v2269_v34  ;;  %v1605_v38 = vmax.f32 %v1477_v5, %v1481_v35  ;;  %v750_v17 = vadd.f32 %v4092_v39, %v570_v47  ;;  %v942_v18 = vmul.f32 %v4093_v44, %v2570_v62  ;;  %v945_v42 = vmul.f32 %v4090_v3, %v4094_v50 }
  0xd2   :  { %v1684_v61 = vmax.f32 %v1604_v10, 0.0  ;;  %v946_v37 = vmul.f32 %v4093_v44, %v4094_v50  ;;  %v1101_v23 = vadd.f32 %v941_v60, %v745_v21  ;;  %v1290_v8 = vmul.f32 %v2835_v46, %v4094_v50  ;;  %v4096_v60 = vld [vmem:[#allocation21_spill] sm:$0xff] }
  0xd3   :  { %v1685_v0 = vmax.f32 %v1605_v38, 0.0  ;;  %v1102_v1 = vadd.f32 %v942_v18, %v746_v43  ;;  %v1105_v7 = vadd.f32 %v945_v42, %v749_v6  ;;  %v1291_v30 = vmul.f32 %v2859_v26, %v4094_v50 }
  0xd4   :  { %v1106_v31 = vadd.f32 %v946_v37, %v750_v17  ;;  %v1294_v19 = vmul.f32 %v2835_v46, %v4095_v22  ;;  %v1295_v32 = vmul.f32 %v2859_v26, %v4095_v22  ;;  %v1450_v52 = vadd.f32 %v1290_v8, %v1101_v23  ;;  %v4097_v23 = vld [vmem:[#allocation22_spill] sm:$0xff] }
  0xd5   :  { %v2301_v36 = vpack.c.bf16 %v1685_v0, %v1684_v61  ;;  %v1451_v25 = vadd.f32 %v1291_v30, %v1102_v1  ;;  %v629_v40 = vmul.f32 %v4088_v59, %v2565_v58  ;;  %v630_v2 = vmul.f32 %v4089_v57, %v2565_v58 }
  0xd6   :  { %v1454_v4 = vadd.f32 %v1294_v19, %v1105_v7  ;;  %v1455_v14 = vadd.f32 %v1295_v32, %v1106_v31  ;;  %v633_v12 = vmul.f32 %v4088_v59, %v2573_v63  ;;  %v634_v13 = vmul.f32 %v4089_v57, %v2573_v63 }
  0xd7   :  { %2302 = vmatpush3.bf16.msra.mxu1 %v2301_v36  ;;  %v809_v5 = vadd.f32 %v4091_v15, %v629_v40  ;;  %v810_v48 = vadd.f32 %v4092_v39, %v630_v2  ;;  %v1005_v33 = vmul.f32 %v4090_v3, %v2573_v63  ;;  %v1006_v51 = vmul.f32 %v4093_v44, %v2573_v63 }
  0xd8   :  { %v1590_v45 = vmax.f32 %v1450_v52, %v1454_v4  ;;  %v1591_v34 = vmax.f32 %v1451_v25, %v1455_v14  ;;  %v813_v35 = vadd.f32 %v4091_v15, %v633_v12  ;;  %v814_v47 = vadd.f32 %v4092_v39, %v634_v13 }
  0xd9   :  { %v1009_v10 = vmul.f32 %v4090_v3, %v4096_v60  ;;  %v1010_v21 = vmul.f32 %v4093_v44, %v4096_v60  ;;  %v1165_v43 = vadd.f32 %v1005_v33, %v809_v5  ;;  %v1166_v6 = vadd.f32 %v1006_v51, %v810_v48  ;;  %v4098_v33 = vld [vmem:[#allocation12_spill] sm:$0xff] }
  0xda   :  { %v1670_v38 = vmax.f32 %v1590_v45, 0.0  ;;  %v1671_v17 = vmax.f32 %v1591_v34, 0.0  ;;  %v1354_v18 = vmul.f32 %v2835_v46, %v4096_v60  ;;  %v1355_v42 = vmul.f32 %v2859_v26, %v4096_v60 }
  0xdb   :  { %v1169_v61 = vadd.f32 %v1009_v10, %v813_v35  ;;  %v1170_v37 = vadd.f32 %v1010_v21, %v814_v47  ;;  %v1358_v8 = vmul.f32 %v2835_v46, %v4097_v23  ;;  %v1359_v0 = vmul.f32 %v2859_v26, %v4097_v23 }
  0xdc   :  { %v2271_v1 = vpack.c.bf16 %v1671_v17, %v1670_v38  ;;  %v1514_v7 = vadd.f32 %v1354_v18, %v1165_v43  ;;  %v1515_v30 = vadd.f32 %v1355_v42, %v1166_v6  ;;  %v533_v31 = vmul.f32 %v4088_v59, %v2589_v11  ;;  %v4099_v17 = vld [vmem:[#allocation13_spill] sm:$0xff] }
  0xdd   :  { %v1518_v19 = vadd.f32 %v1358_v8, %v1169_v61  ;;  %v1519_v32 = vadd.f32 %v1359_v0, %v1170_v37  ;;  %v534_v52 = vmul.f32 %v4089_v57, %v2589_v11  ;;  %v537_v36 = vmul.f32 %v4088_v59, %v4082_v41 }
  0xde   :  { %2272 = vmatprep.subr.bf16.mxu0 %v2271_v1  ;;  %v538_v25 = vmul.f32 %v4089_v57, %v4082_v41  ;;  %v713_v40 = vadd.f32 %v4091_v15, %v533_v31  ;;  %v909_v2 = vmul.f32 %v4090_v3, %v4082_v41  ;;  %v910_v4 = vmul.f32 %v4093_v44, %v4082_v41 }
  0xdf   :  { %v1622_v14 = vmax.f32 %v1514_v7, %v1518_v19  ;;  %v1623_v12 = vmax.f32 %v1515_v30, %v1519_v32  ;;  %v714_v13 = vadd.f32 %v4092_v39, %v534_v52  ;;  %v717_v5 = vadd.f32 %v4091_v15, %v537_v36 }
  0xe0   :  { %v718_v48 = vadd.f32 %v4092_v39, %v538_v25  ;;  %v913_v51 = vmul.f32 %v4090_v3, %v4098_v33  ;;  %v914_v45 = vmul.f32 %v4093_v44, %v4098_v33  ;;  %v1069_v34 = vadd.f32 %v909_v2, %v713_v40 }
  0xe1   :  { %v1702_v35 = vmax.f32 %v1622_v14, 0.0  ;;  %v1703_v47 = vmax.f32 %v1623_v12, 0.0  ;;  %v1070_v10 = vadd.f32 %v910_v4, %v714_v13  ;;  %v1258_v21 = vmul.f32 %v2835_v46, %v4098_v33  ;;  %v4100_v12 = vld [vmem:[#allocation23_spill] sm:$0xff] }
  0xe2   :  { %v1073_v43 = vadd.f32 %v913_v51, %v717_v5  ;;  %v1074_v6 = vadd.f32 %v914_v45, %v718_v48  ;;  %v1259_v38 = vmul.f32 %v2859_v26, %v4098_v33  ;;  %v1262_v18 = vmul.f32 %v2835_v46, %v4099_v17 }
  0xe3   :  { %v2303_v42 = vpack.c.bf16 %v1703_v47, %v1702_v35  ;;  %v1263_v61 = vmul.f32 %v2859_v26, %v4099_v17  ;;  %v1418_v37 = vadd.f32 %v1258_v21, %v1069_v34  ;;  %v597_v8 = vmul.f32 %v4088_v59, %v2612_v27 }
  0xe4   :  { %v1419_v0 = vadd.f32 %v1259_v38, %v1070_v10  ;;  %v1422_v1 = vadd.f32 %v1262_v18, %v1073_v43  ;;  %v598_v7 = vmul.f32 %v4089_v57, %v2612_v27  ;;  %v601_v30 = vmul.f32 %v4088_v59, %v2615_v28  ;;  %v4101_v43 = vld [vmem:[#allocation24_spill] sm:$0xff] }
  0xe5   :  { %2304 = vmatprep.subr.bf16.mxu1 %v2303_v42  ;;  %v1423_v31 = vadd.f32 %v1263_v61, %v1074_v6  ;;  %v602_v19 = vmul.f32 %v4089_v57, %v2615_v28  ;;  %v777_v32 = vadd.f32 %v4091_v15, %v597_v8  ;;  %v973_v52 = vmul.f32 %v4090_v3, %v2615_v28  ;;  %v4102_v42 = vld [vmem:[#allocation37_spill] sm:$0xff] }
  0xe6   :  { %v1574_v36 = vmax.f32 %v1418_v37, %v1422_v1  ;;  %v778_v25 = vadd.f32 %v4092_v39, %v598_v7  ;;  %v781_v40 = vadd.f32 %v4091_v15, %v601_v30  ;;  %v974_v2 = vmul.f32 %v4093_v44, %v2615_v28 }
  0xe7   :  { %v1575_v4 = vmax.f32 %v1419_v0, %v1423_v31  ;;  %v782_v14 = vadd.f32 %v4092_v39, %v602_v19  ;;  %v977_v13 = vmul.f32 %v4090_v3, %v4100_v12  ;;  %v978_v5 = vmul.f32 %v4093_v44, %v4100_v12  ;;  %v4103_v0 = vld [vmem:[#allocation35_spill] sm:$0xff] }
  0xe8   :  { %v1654_v48 = vmax.f32 %v1574_v36, 0.0  ;;  %v1133_v51 = vadd.f32 %v973_v52, %v777_v32  ;;  %v1134_v45 = vadd.f32 %v974_v2, %v778_v25  ;;  %v1322_v34 = vmul.f32 %v2835_v46, %v4100_v12 }
  0xe9   :  { %v1655_v35 = vmax.f32 %v1575_v4, 0.0  ;;  %v1137_v47 = vadd.f32 %v977_v13, %v781_v40  ;;  %v1138_v10 = vadd.f32 %v978_v5, %v782_v14  ;;  %v1323_v21 = vmul.f32 %v2859_v26, %v4100_v12 }
  0xea   :  { %v1326_v6 = vmul.f32 %v2835_v46, %v4101_v43  ;;  %v1327_v38 = vmul.f32 %v2859_v26, %v4101_v43  ;;  %v1482_v18 = vadd.f32 %v1322_v34, %v1133_v51  ;;  %v567_v61 = vmul.f32 %v4102_v42, %v2559_v55 }
  0xeb   :  { %v2273_v37 = vpack.c.bf16 %v1655_v35, %v1654_v48  ;;  %v1483_v8 = vadd.f32 %v1323_v21, %v1134_v45  ;;  %v568_v1 = vmul.f32 %v4103_v0, %v2559_v55  ;;  %v571_v7 = vmul.f32 %v4102_v42, %v2570_v62 }
  0xec   :  { %v1486_v30 = vadd.f32 %v1326_v6, %v1137_v47  ;;  %v1487_v31 = vadd.f32 %v1327_v38, %v1138_v10  ;;  %v572_v19 = vmul.f32 %v4103_v0, %v2570_v62  ;;  %v747_v32 = vadd.f32 %v2761_v20, %v567_v61 }
  0xed   :  { %2274 = vmatpush3.bf16.msra.mxu0 %v2273_v37  ;;  %v748_v52 = vadd.f32 %v2880_v53, %v568_v1  ;;  %v751_v36 = vadd.f32 %v2761_v20, %v571_v7  ;;  %v943_v25 = vmul.f32 %v2878_v16, %v2570_v62  ;;  %v944_v55 = vmul.f32 %v2896_v29, %v2570_v62 }
  0xee   :  { %v1606_v40 = vmax.f32 %v1482_v18, %v1486_v30  ;;  %v1607_v2 = vmax.f32 %v1483_v8, %v1487_v31  ;;  %v752_v4 = vadd.f32 %v2880_v53, %v572_v19  ;;  %v947_v14 = vmul.f32 %v2878_v16, %v4094_v50 }
  0xef   :  { %v948_v13 = vmul.f32 %v2896_v29, %v4094_v50  ;;  %v1103_v5 = vadd.f32 %v943_v25, %v747_v32  ;;  %v1104_v48 = vadd.f32 %v944_v55, %v748_v52  ;;  %v1292_v51 = vmul.f32 %v2919_v24, %v4094_v50 }
  0xf0   :  { %v1686_v45 = vmax.f32 %v1606_v40, 0.0  ;;  %v1687_v34 = vmax.f32 %v1607_v2, 0.0  ;;  %v1107_v35 = vadd.f32 %v947_v14, %v751_v36  ;;  %v1293_v62 = vmul.f32 %v2894_v49, %v4094_v50 }
  0xf1   :  { %v1108_v47 = vadd.f32 %v948_v13, %v752_v4  ;;  %v1296_v10 = vmul.f32 %v2919_v24, %v4095_v22  ;;  %v1297_v21 = vmul.f32 %v2894_v49, %v4095_v22  ;;  %v1452_v6 = vadd.f32 %v1292_v51, %v1103_v5 }
  0xf2   :  { %v2305_v38 = vpack.c.bf16 %v1687_v34, %v1686_v45  ;;  %v1453_v18 = vadd.f32 %v1293_v62, %v1104_v48  ;;  %v631_v61 = vmul.f32 %v4102_v42, %v2565_v58  ;;  %v632_v37 = vmul.f32 %v4103_v0, %v2565_v58 }
  0xf3   :  { %v1456_v8 = vadd.f32 %v1296_v10, %v1107_v35  ;;  %v1457_v1 = vadd.f32 %v1297_v21, %v1108_v47  ;;  %v635_v7 = vmul.f32 %v4102_v42, %v2573_v63  ;;  %v636_v30 = vmul.f32 %v4103_v0, %v2573_v63 }
  0xf4   :  { %2306 = vmatpush3.bf16.msra.mxu1 %v2305_v38  ;;  %v811_v31 = vadd.f32 %v2761_v20, %v631_v61  ;;  %v812_v19 = vadd.f32 %v2880_v53, %v632_v37  ;;  %v1007_v32 = vmul.f32 %v2878_v16, %v2573_v63  ;;  %v1008_v52 = vmul.f32 %v2896_v29, %v2573_v63 }
  0xf5   :  { %v1592_v58 = vmax.f32 %v1452_v6, %v1456_v8  ;;  %v1593_v36 = vmax.f32 %v1453_v18, %v1457_v1  ;;  %v815_v25 = vadd.f32 %v2761_v20, %v635_v7  ;;  %v816_v55 = vadd.f32 %v2880_v53, %v636_v30 }
  0xf6   :  { %v1011_v40 = vmul.f32 %v2878_v16, %v4096_v60  ;;  %v1012_v2 = vmul.f32 %v2896_v29, %v4096_v60  ;;  %v1167_v4 = vadd.f32 %v1007_v32, %v811_v31  ;;  %v1168_v14 = vadd.f32 %v1008_v52, %v812_v19 }
  0xf7   :  { %v1672_v13 = vmax.f32 %v1592_v58, 0.0  ;;  %v1673_v5 = vmax.f32 %v1593_v36, 0.0  ;;  %v1356_v48 = vmul.f32 %v2919_v24, %v4096_v60  ;;  %v1357_v63 = vmul.f32 %v2894_v49, %v4096_v60 }
  0xf8   :  { %v1171_v51 = vadd.f32 %v1011_v40, %v815_v25  ;;  %v1172_v45 = vadd.f32 %v1012_v2, %v816_v55  ;;  %v1360_v34 = vmul.f32 %v2919_v24, %v4097_v23  ;;  %v1361_v35 = vmul.f32 %v2894_v49, %v4097_v23 }
  0xf9   :  { %v2275_v62 = vpack.c.bf16 %v1673_v5, %v1672_v13  ;;  %v1516_v47 = vadd.f32 %v1356_v48, %v1167_v4  ;;  %v1517_v10 = vadd.f32 %v1357_v63, %v1168_v14  ;;  %v535_v21 = vmul.f32 %v4102_v42, %v2589_v11 }
  0xfa   :  { %v1520_v6 = vadd.f32 %v1360_v34, %v1171_v51  ;;  %v1521_v38 = vadd.f32 %v1361_v35, %v1172_v45  ;;  %v536_v18 = vmul.f32 %v4103_v0, %v2589_v11  ;;  %v539_v61 = vmul.f32 %v4102_v42, %v4082_v41 }
  0xfb   :  { %2276 = vmatprep.subr.bf16.mxu0 %v2275_v62  ;;  %v540_v37 = vmul.f32 %v4103_v0, %v4082_v41  ;;  %v715_v8 = vadd.f32 %v2761_v20, %v535_v21  ;;  %v911_v1 = vmul.f32 %v2878_v16, %v4082_v41  ;;  %v912_v7 = vmul.f32 %v2896_v29, %v4082_v41 }
  0xfc   :  { %v1624_v30 = vmax.f32 %v1516_v47, %v1520_v6  ;;  %v1625_v31 = vmax.f32 %v1517_v10, %v1521_v38  ;;  %v716_v19 = vadd.f32 %v2880_v53, %v536_v18  ;;  %v719_v11 = vadd.f32 %v2761_v20, %v539_v61 }
  0xfd   :  { %v720_v32 = vadd.f32 %v2880_v53, %v540_v37  ;;  %v915_v52 = vmul.f32 %v2878_v16, %v4098_v33  ;;  %v916_v58 = vmul.f32 %v2896_v29, %v4098_v33  ;;  %v1071_v36 = vadd.f32 %v911_v1, %v715_v8 }
  0xfe   :  { %v1704_v25 = vmax.f32 %v1624_v30, 0.0  ;;  %v1705_v55 = vmax.f32 %v1625_v31, 0.0  ;;  %v1072_v40 = vadd.f32 %v912_v7, %v716_v19  ;;  %v1260_v41 = vmul.f32 %v2919_v24, %v4098_v33 }
  0xff   :  { %v1075_v2 = vadd.f32 %v915_v52, %v719_v11  ;;  %v1076_v4 = vadd.f32 %v916_v58, %v720_v32  ;;  %v1261_v14 = vmul.f32 %v2894_v49, %v4098_v33  ;;  %v1264_v13 = vmul.f32 %v2919_v24, %v4099_v17 }
 0x100   :  { %v2307_v5 = vpack.c.bf16 %v1705_v55, %v1704_v25  ;;  %v1265_v48 = vmul.f32 %v2894_v49, %v4099_v17  ;;  %v1420_v63 = vadd.f32 %v1260_v41, %v1071_v36  ;;  %v599_v51 = vmul.f32 %v4102_v42, %v2612_v27 }
 0x101   :  { %v1421_v45 = vadd.f32 %v1261_v14, %v1072_v40  ;;  %v1424_v34 = vadd.f32 %v1264_v13, %v1075_v2  ;;  %v600_v35 = vmul.f32 %v4103_v0, %v2612_v27  ;;  %v603_v62 = vmul.f32 %v4102_v42, %v2615_v28 }
 0x102   :  { %2308 = vmatprep.subr.bf16.mxu1 %v2307_v5  ;;  %v1425_v47 = vadd.f32 %v1265_v48, %v1076_v4  ;;  %v604_v10 = vmul.f32 %v4103_v0, %v2615_v28  ;;  %v779_v21 = vadd.f32 %v2761_v20, %v599_v51  ;;  %v975_v6 = vmul.f32 %v2878_v16, %v2615_v28 }
 0x103   :  { %v1576_v38 = vmax.f32 %v1420_v63, %v1424_v34  ;;  %v780_v18 = vadd.f32 %v2880_v53, %v600_v35  ;;  %v783_v61 = vadd.f32 %v2761_v20, %v603_v62  ;;  %v976_v27 = vmul.f32 %v2896_v29, %v2615_v28 }
 0x104   :  { %v1577_v37 = vmax.f32 %v1421_v45, %v1425_v47  ;;  %v784_v8 = vadd.f32 %v2880_v53, %v604_v10  ;;  %v979_v1 = vmul.f32 %v2878_v16, %v4100_v12  ;;  %v980_v7 = vmul.f32 %v2896_v29, %v4100_v12 }
 0x105   :  { %v1656_v30 = vmax.f32 %v1576_v38, 0.0  ;;  %v1135_v31 = vadd.f32 %v975_v6, %v779_v21  ;;  %v1136_v19 = vadd.f32 %v976_v27, %v780_v18  ;;  %v1324_v11 = vmul.f32 %v2919_v24, %v4100_v12  ;;  %v4104_v21 = vld [vmem:[#allocation25_spill] sm:$0xff] }
 0x106   :  { %v1657_v32 = vmax.f32 %v1577_v37, 0.0  ;;  %v1139_v52 = vadd.f32 %v979_v1, %v783_v61  ;;  %v1140_v58 = vadd.f32 %v980_v7, %v784_v8  ;;  %v1325_v28 = vmul.f32 %v2894_v49, %v4100_v12 }
 0x107   :  { %v1328_v36 = vmul.f32 %v2919_v24, %v4101_v43  ;;  %v1329_v25 = vmul.f32 %v2894_v49, %v4101_v43  ;;  %v1484_v55 = vadd.f32 %v1324_v11, %v1135_v31  ;;  %v573_v40 = vmul.f32 %v4088_v59, %v4094_v50  ;;  %v4105_v31 = vld [vmem:[#allocation26_spill] sm:$0xff] }
 0x108   :  { %v2277_v41 = vpack.c.bf16 %v1657_v32, %v1656_v30  ;;  %v1485_v2 = vadd.f32 %v1325_v28, %v1136_v19  ;;  %v574_v4 = vmul.f32 %v4089_v57, %v4094_v50  ;;  %v577_v14 = vmul.f32 %v4088_v59, %v4095_v22 }
 0x109   :  { %v1488_v13 = vadd.f32 %v1328_v36, %v1139_v52  ;;  %v1489_v5 = vadd.f32 %v1329_v25, %v1140_v58  ;;  %v578_v48 = vmul.f32 %v4089_v57, %v4095_v22  ;;  %v753_v63 = vadd.f32 %v4091_v15, %v573_v40  ;;  %v1731_v25 = vld [vmem:[%s3996_s3 + $0x8] sm:$0xff] }
 0x10a   :  { %2278 = vmatpush3.bf16.msra.mxu0 %v2277_v41  ;;  %v754_v51 = vadd.f32 %v4092_v39, %v574_v4  ;;  %v757_v45 = vadd.f32 %v4091_v15, %v577_v14  ;;  %v949_v34 = vmul.f32 %v4090_v3, %v4095_v22  ;;  %v950_v35 = vmul.f32 %v4093_v44, %v4095_v22 }
 0x10b   :  { %v1608_v62 = vmax.f32 %v1484_v55, %v1488_v13  ;;  %v1609_v47 = vmax.f32 %v1485_v2, %v1489_v5  ;;  %v758_v10 = vadd.f32 %v4092_v39, %v578_v48  ;;  %v953_v6 = vmul.f32 %v4090_v3, %v4104_v21  ;;  %v1733_v55 = vld [vmem:[%s3996_s3 + $0x18] sm:$0xff]  ;;  %1816 = vmatprep.mubr.f32.mxu0 %v1731_v25 }
 0x10c   :  { %v954_v38 = vmul.f32 %v4093_v44, %v4104_v21  ;;  %v1109_v18 = vadd.f32 %v949_v34, %v753_v63  ;;  %v1110_v61 = vadd.f32 %v950_v35, %v754_v51  ;;  %v1298_v27 = vmul.f32 %v2835_v46, %v4104_v21  ;;  %1891 = vmatprep.mubr.f32.mxu1 %v1733_v55  ;;  %v4106_v35 = vld [vmem:[#allocation29_spill] sm:$0xff] }
 0x10d   :  { %v1688_v37 = vmax.f32 %v1608_v62, 0.0  ;;  %v1689_v8 = vmax.f32 %v1609_v47, 0.0  ;;  %v1113_v1 = vadd.f32 %v953_v6, %v757_v45  ;;  %v1299_v7 = vmul.f32 %v2859_v26, %v4104_v21 }
 0x10e   :  { %v1114_v30 = vadd.f32 %v954_v38, %v758_v10  ;;  %v1302_v19 = vmul.f32 %v2835_v46, %v4105_v31  ;;  %v1303_v11 = vmul.f32 %v2859_v26, %v4105_v31  ;;  %v1458_v32 = vadd.f32 %v1298_v27, %v1109_v18 }
 0x10f   :  { %v2309_v52 = vpack.c.bf16 %v1689_v8, %v1688_v37  ;;  %v1459_v58 = vadd.f32 %v1299_v7, %v1110_v61  ;;  %v637_v28 = vmul.f32 %v4088_v59, %v4096_v60  ;;  %v638_v36 = vmul.f32 %v4089_v57, %v4096_v60 }
 0x110   :  { %v1462_v40 = vadd.f32 %v1302_v19, %v1113_v1  ;;  %v1463_v41 = vadd.f32 %v1303_v11, %v1114_v30  ;;  %v641_v2 = vmul.f32 %v4088_v59, %v4097_v23  ;;  %v642_v4 = vmul.f32 %v4089_v57, %v4097_v23  ;;  %v4107_v1 = vld [vmem:[#allocation30_spill] sm:$0xff] }
 0x111   :  { %2310 = vmatpush3.bf16.msra.mxu1 %v2309_v52  ;;  %v817_v14 = vadd.f32 %v4091_v15, %v637_v28  ;;  %v818_v13 = vadd.f32 %v4092_v39, %v638_v36  ;;  %v1013_v5 = vmul.f32 %v4090_v3, %v4097_v23  ;;  %v1014_v48 = vmul.f32 %v4093_v44, %v4097_v23 }
 0x112   :  { %v1594_v63 = vmax.f32 %v1458_v32, %v1462_v40  ;;  %v1595_v51 = vmax.f32 %v1459_v58, %v1463_v41  ;;  %v821_v45 = vadd.f32 %v4091_v15, %v641_v2  ;;  %v822_v34 = vadd.f32 %v4092_v39, %v642_v4 }
 0x113   :  { %v1017_v62 = vmul.f32 %v4090_v3, %v4106_v35  ;;  %v1018_v47 = vmul.f32 %v4093_v44, %v4106_v35  ;;  %v1173_v10 = vadd.f32 %v1013_v5, %v817_v14  ;;  %v1174_v6 = vadd.f32 %v1014_v48, %v818_v13 }
 0x114   :  { %v1674_v38 = vmax.f32 %v1594_v63, 0.0  ;;  %v1675_v18 = vmax.f32 %v1595_v51, 0.0  ;;  %v1362_v61 = vmul.f32 %v2835_v46, %v4106_v35  ;;  %v1363_v27 = vmul.f32 %v2859_v26, %v4106_v35  ;;  %v4108_v63 = vld [vmem:[#allocation14_spill] sm:$0xff] }
 0x115   :  { %v1177_v37 = vadd.f32 %v1017_v62, %v821_v45  ;;  %v1178_v8 = vadd.f32 %v1018_v47, %v822_v34  ;;  %v1366_v7 = vmul.f32 %v2835_v46, %v4107_v1  ;;  %v1367_v30 = vmul.f32 %v2859_v26, %v4107_v1 }
 0x116   :  { %v2279_v19 = vpack.c.bf16 %v1675_v18, %v1674_v38  ;;  %v1522_v11 = vadd.f32 %v1362_v61, %v1173_v10  ;;  %v1523_v32 = vadd.f32 %v1363_v27, %v1174_v6  ;;  %v541_v52 = vmul.f32 %v4088_v59, %v4098_v33  ;;  %v4109_v27 = vld [vmem:[#allocation16_spill] sm:$0xff] }
 0x117   :  { %v1526_v58 = vadd.f32 %v1366_v7, %v1177_v37  ;;  %v1527_v28 = vadd.f32 %v1367_v30, %v1178_v8  ;;  %v542_v36 = vmul.f32 %v4089_v57, %v4098_v33  ;;  %v545_v25 = vmul.f32 %v4088_v59, %v4099_v17 }
 0x118   :  { %2280 = vmatprep.subr.bf16.mxu0 %v2279_v19  ;;  %v546_v55 = vmul.f32 %v4089_v57, %v4099_v17  ;;  %v721_v40 = vadd.f32 %v4091_v15, %v541_v52  ;;  %v917_v41 = vmul.f32 %v4090_v3, %v4099_v17  ;;  %v918_v2 = vmul.f32 %v4093_v44, %v4099_v17 }
 0x119   :  { %v1626_v4 = vmax.f32 %v1522_v11, %v1526_v58  ;;  %v1627_v14 = vmax.f32 %v1523_v32, %v1527_v28  ;;  %v722_v13 = vadd.f32 %v4092_v39, %v542_v36  ;;  %v725_v5 = vadd.f32 %v4091_v15, %v545_v25 }
 0x11a   :  { %v726_v48 = vadd.f32 %v4092_v39, %v546_v55  ;;  %v921_v51 = vmul.f32 %v4090_v3, %v4108_v63  ;;  %v922_v45 = vmul.f32 %v4093_v44, %v4108_v63  ;;  %v1077_v34 = vadd.f32 %v917_v41, %v721_v40 }
 0x11b   :  { %v1706_v62 = vmax.f32 %v1626_v4, 0.0  ;;  %v1707_v47 = vmax.f32 %v1627_v14, 0.0  ;;  %v1078_v10 = vadd.f32 %v918_v2, %v722_v13  ;;  %v1266_v6 = vmul.f32 %v2835_v46, %v4108_v63 }
 0x11c   :  { %v1081_v38 = vadd.f32 %v921_v51, %v725_v5  ;;  %v1082_v18 = vadd.f32 %v922_v45, %v726_v48  ;;  %v1267_v61 = vmul.f32 %v2859_v26, %v4108_v63  ;;  %v1270_v37 = vmul.f32 %v2835_v46, %v4109_v27  ;;  %v4110_v5 = vld [vmem:[#allocation31_spill] sm:$0xff] }
 0x11d   :  { %v2311_v8 = vpack.c.bf16 %v1707_v47, %v1706_v62  ;;  %v1271_v7 = vmul.f32 %v2859_v26, %v4109_v27  ;;  %v1426_v30 = vadd.f32 %v1266_v6, %v1077_v34  ;;  %v605_v19 = vmul.f32 %v4088_v59, %v4100_v12 }
 0x11e   :  { %v1427_v11 = vadd.f32 %v1267_v61, %v1078_v10  ;;  %v1430_v32 = vadd.f32 %v1270_v37, %v1081_v38  ;;  %v606_v52 = vmul.f32 %v4089_v57, %v4100_v12  ;;  %v609_v58 = vmul.f32 %v4088_v59, %v4101_v43  ;;  %v4111_v61 = vld [vmem:[#allocation32_spill] sm:$0xff] }
 0x11f   :  { %2312 = vmatprep.subr.bf16.mxu1 %v2311_v8  ;;  %v1431_v28 = vadd.f32 %v1271_v7, %v1082_v18  ;;  %v610_v36 = vmul.f32 %v4089_v57, %v4101_v43  ;;  %v785_v25 = vadd.f32 %v4091_v15, %v605_v19  ;;  %v981_v55 = vmul.f32 %v4090_v3, %v4101_v43 }
 0x120   :  { %v1578_v40 = vmax.f32 %v1426_v30, %v1430_v32  ;;  %v786_v41 = vadd.f32 %v4092_v39, %v606_v52  ;;  %v789_v2 = vadd.f32 %v4091_v15, %v609_v58  ;;  %v982_v4 = vmul.f32 %v4093_v44, %v4101_v43 }
 0x121   :  { %v1579_v14 = vmax.f32 %v1427_v11, %v1431_v28  ;;  %v790_v13 = vadd.f32 %v4092_v39, %v610_v36  ;;  %v985_v48 = vmul.f32 %v4090_v3, %v4110_v5  ;;  %v986_v51 = vmul.f32 %v4093_v44, %v4110_v5 }
 0x122   :  { %v1658_v45 = vmax.f32 %v1578_v40, 0.0  ;;  %v1141_v34 = vadd.f32 %v981_v55, %v785_v25  ;;  %v1142_v62 = vadd.f32 %v982_v4, %v786_v41  ;;  %v1330_v47 = vmul.f32 %v2835_v46, %v4110_v5 }
 0x123   :  { %v1659_v10 = vmax.f32 %v1579_v14, 0.0  ;;  %v1145_v6 = vadd.f32 %v985_v48, %v789_v2  ;;  %v1146_v38 = vadd.f32 %v986_v51, %v790_v13  ;;  %v1331_v18 = vmul.f32 %v2859_v26, %v4110_v5 }
 0x124   :  { %v1334_v37 = vmul.f32 %v2835_v46, %v4111_v61  ;;  %v1335_v8 = vmul.f32 %v2859_v26, %v4111_v61  ;;  %v1490_v7 = vadd.f32 %v1330_v47, %v1141_v34  ;;  %v575_v30 = vmul.f32 %v4102_v42, %v4094_v50 }
 0x125   :  { %v2281_v19 = vpack.c.bf16 %v1659_v10, %v1658_v45  ;;  %v1491_v11 = vadd.f32 %v1331_v18, %v1142_v62  ;;  %v576_v32 = vmul.f32 %v4103_v0, %v4094_v50  ;;  %v579_v52 = vmul.f32 %v4102_v42, %v4095_v22 }
 0x126   :  { %v1494_v58 = vadd.f32 %v1334_v37, %v1145_v6  ;;  %v1495_v28 = vadd.f32 %v1335_v8, %v1146_v38  ;;  %v580_v36 = vmul.f32 %v4103_v0, %v4095_v22  ;;  %v755_v25 = vadd.f32 %v2761_v20, %v575_v30 }
 0x127   :  { %2282 = vmatpush3.bf16.msra.mxu0 %v2281_v19  ;;  %v756_v55 = vadd.f32 %v2880_v53, %v576_v32  ;;  %v759_v40 = vadd.f32 %v2761_v20, %v579_v52  ;;  %v951_v41 = vmul.f32 %v2878_v16, %v4095_v22  ;;  %v952_v50 = vmul.f32 %v2896_v29, %v4095_v22 }
 0x128   :  { %v1610_v2 = vmax.f32 %v1490_v7, %v1494_v58  ;;  %v1611_v4 = vmax.f32 %v1491_v11, %v1495_v28  ;;  %v760_v14 = vadd.f32 %v2880_v53, %v580_v36  ;;  %v955_v13 = vmul.f32 %v2878_v16, %v4104_v21 }
 0x129   :  { %v956_v48 = vmul.f32 %v2896_v29, %v4104_v21  ;;  %v1111_v51 = vadd.f32 %v951_v41, %v755_v25  ;;  %v1112_v45 = vadd.f32 %v952_v50, %v756_v55  ;;  %v1300_v34 = vmul.f32 %v2919_v24, %v4104_v21 }
 0x12a   :  { %v1690_v62 = vmax.f32 %v1610_v2, 0.0  ;;  %v1691_v47 = vmax.f32 %v1611_v4, 0.0  ;;  %v1115_v10 = vadd.f32 %v955_v13, %v759_v40  ;;  %v1301_v22 = vmul.f32 %v2894_v49, %v4104_v21 }
 0x12b   :  { %v1116_v6 = vadd.f32 %v956_v48, %v760_v14  ;;  %v1304_v38 = vmul.f32 %v2919_v24, %v4105_v31  ;;  %v1305_v18 = vmul.f32 %v2894_v49, %v4105_v31  ;;  %v1460_v37 = vadd.f32 %v1300_v34, %v1111_v51 }
 0x12c   :  { %v2313_v8 = vpack.c.bf16 %v1691_v47, %v1690_v62  ;;  %v1461_v7 = vadd.f32 %v1301_v22, %v1112_v45  ;;  %v639_v30 = vmul.f32 %v4102_v42, %v4096_v60  ;;  %v640_v19 = vmul.f32 %v4103_v0, %v4096_v60 }
 0x12d   :  { %v1464_v11 = vadd.f32 %v1304_v38, %v1115_v10  ;;  %v1465_v32 = vadd.f32 %v1305_v18, %v1116_v6  ;;  %v643_v52 = vmul.f32 %v4102_v42, %v4097_v23  ;;  %v644_v58 = vmul.f32 %v4103_v0, %v4097_v23 }
 0x12e   :  { %2314 = vmatpush3.bf16.msra.mxu1 %v2313_v8  ;;  %v819_v28 = vadd.f32 %v2761_v20, %v639_v30  ;;  %v820_v36 = vadd.f32 %v2880_v53, %v640_v19  ;;  %v1015_v25 = vmul.f32 %v2878_v16, %v4097_v23  ;;  %v1016_v55 = vmul.f32 %v2896_v29, %v4097_v23 }
 0x12f   :  { %v1596_v60 = vmax.f32 %v1460_v37, %v1464_v11  ;;  %v1597_v40 = vmax.f32 %v1461_v7, %v1465_v32  ;;  %v823_v41 = vadd.f32 %v2761_v20, %v643_v52  ;;  %v824_v50 = vadd.f32 %v2880_v53, %v644_v58 }
 0x130   :  { %v1019_v2 = vmul.f32 %v2878_v16, %v4106_v35  ;;  %v1020_v4 = vmul.f32 %v2896_v29, %v4106_v35  ;;  %v1175_v14 = vadd.f32 %v1015_v25, %v819_v28  ;;  %v1176_v13 = vadd.f32 %v1016_v55, %v820_v36 }
 0x131   :  { %v1676_v48 = vmax.f32 %v1596_v60, 0.0  ;;  %v1677_v51 = vmax.f32 %v1597_v40, 0.0  ;;  %v1364_v45 = vmul.f32 %v2919_v24, %v4106_v35  ;;  %v1365_v23 = vmul.f32 %v2894_v49, %v4106_v35 }
 0x132   :  { %v1179_v34 = vadd.f32 %v1019_v2, %v823_v41  ;;  %v1180_v62 = vadd.f32 %v1020_v4, %v824_v50  ;;  %v1368_v47 = vmul.f32 %v2919_v24, %v4107_v1  ;;  %v1369_v10 = vmul.f32 %v2894_v49, %v4107_v1 }
 0x133   :  { %v2283_v22 = vpack.c.bf16 %v1677_v51, %v1676_v48  ;;  %v1524_v6 = vadd.f32 %v1364_v45, %v1175_v14  ;;  %v1525_v38 = vadd.f32 %v1365_v23, %v1176_v13  ;;  %v543_v18 = vmul.f32 %v4102_v42, %v4098_v33 }
 0x134   :  { %v1528_v37 = vadd.f32 %v1368_v47, %v1179_v34  ;;  %v1529_v8 = vadd.f32 %v1369_v10, %v1180_v62  ;;  %v544_v7 = vmul.f32 %v4103_v0, %v4098_v33  ;;  %v547_v30 = vmul.f32 %v4102_v42, %v4099_v17 }
 0x135   :  { %2284 = vmatprep.subr.bf16.mxu0 %v2283_v22  ;;  %v548_v19 = vmul.f32 %v4103_v0, %v4099_v17  ;;  %v723_v11 = vadd.f32 %v2761_v20, %v543_v18  ;;  %v919_v32 = vmul.f32 %v2878_v16, %v4099_v17  ;;  %v920_v52 = vmul.f32 %v2896_v29, %v4099_v17 }
 0x136   :  { %v1628_v58 = vmax.f32 %v1524_v6, %v1528_v37  ;;  %v1629_v28 = vmax.f32 %v1525_v38, %v1529_v8  ;;  %v724_v36 = vadd.f32 %v2880_v53, %v544_v7  ;;  %v727_v33 = vadd.f32 %v2761_v20, %v547_v30 }
 0x137   :  { %v728_v25 = vadd.f32 %v2880_v53, %v548_v19  ;;  %v923_v55 = vmul.f32 %v2878_v16, %v4108_v63  ;;  %v924_v60 = vmul.f32 %v2896_v29, %v4108_v63  ;;  %v1079_v40 = vadd.f32 %v919_v32, %v723_v11 }
 0x138   :  { %v1708_v41 = vmax.f32 %v1628_v58, 0.0  ;;  %v1709_v50 = vmax.f32 %v1629_v28, 0.0  ;;  %v1080_v2 = vadd.f32 %v920_v52, %v724_v36  ;;  %v1268_v17 = vmul.f32 %v2919_v24, %v4108_v63 }
 0x139   :  { %v1083_v4 = vadd.f32 %v923_v55, %v727_v33  ;;  %v1084_v14 = vadd.f32 %v924_v60, %v728_v25  ;;  %v1269_v13 = vmul.f32 %v2894_v49, %v4108_v63  ;;  %v1272_v48 = vmul.f32 %v2919_v24, %v4109_v27 }
 0x13a   :  { %v2315_v51 = vpack.c.bf16 %v1709_v50, %v1708_v41  ;;  %v1273_v45 = vmul.f32 %v2894_v49, %v4109_v27  ;;  %v1428_v23 = vadd.f32 %v1268_v17, %v1079_v40  ;;  %v607_v34 = vmul.f32 %v4102_v42, %v4100_v12 }
 0x13b   :  { %v1429_v62 = vadd.f32 %v1269_v13, %v1080_v2  ;;  %v1432_v47 = vadd.f32 %v1272_v48, %v1083_v4  ;;  %v608_v10 = vmul.f32 %v4103_v0, %v4100_v12  ;;  %v611_v22 = vmul.f32 %v4102_v42, %v4101_v43 }
 0x13c   :  { %2316 = vmatprep.subr.bf16.mxu1 %v2315_v51  ;;  %v1433_v6 = vadd.f32 %v1273_v45, %v1084_v14  ;;  %v612_v38 = vmul.f32 %v4103_v0, %v4101_v43  ;;  %v787_v18 = vadd.f32 %v2761_v20, %v607_v34  ;;  %v983_v37 = vmul.f32 %v2878_v16, %v4101_v43 }
 0x13d   :  { %v1580_v8 = vmax.f32 %v1428_v23, %v1432_v47  ;;  %v788_v7 = vadd.f32 %v2880_v53, %v608_v10  ;;  %v791_v30 = vadd.f32 %v2761_v20, %v611_v22  ;;  %v984_v12 = vmul.f32 %v2896_v29, %v4101_v43 }
 0x13e   :  { %v1581_v19 = vmax.f32 %v1429_v62, %v1433_v6  ;;  %v792_v11 = vadd.f32 %v2880_v53, %v612_v38  ;;  %v987_v32 = vmul.f32 %v2878_v16, %v4110_v5  ;;  %v988_v52 = vmul.f32 %v2896_v29, %v4110_v5 }
 0x13f   :  { %v1660_v58 = vmax.f32 %v1580_v8, 0.0  ;;  %v1143_v28 = vadd.f32 %v983_v37, %v787_v18  ;;  %v1144_v36 = vadd.f32 %v984_v12, %v788_v7  ;;  %v1332_v33 = vmul.f32 %v2919_v24, %v4110_v5  ;;  %v4112_v18 = vld [vmem:[#allocation17_spill] sm:$0xff] }
 0x140   :  { %v1661_v25 = vmax.f32 %v1581_v19, 0.0  ;;  %v1147_v55 = vadd.f32 %v987_v32, %v791_v30  ;;  %v1148_v60 = vadd.f32 %v988_v52, %v792_v11  ;;  %v1333_v43 = vmul.f32 %v2894_v49, %v4110_v5 }
 0x141   :  { %v1336_v40 = vmul.f32 %v2919_v24, %v4111_v61  ;;  %v1337_v41 = vmul.f32 %v2894_v49, %v4111_v61  ;;  %v1492_v50 = vadd.f32 %v1332_v33, %v1143_v28  ;;  %v581_v2 = vmul.f32 %v4088_v59, %v4104_v21 }
 0x142   :  { %v2285_v17 = vpack.c.bf16 %v1661_v25, %v1660_v58  ;;  %v1493_v4 = vadd.f32 %v1333_v43, %v1144_v36  ;;  %v582_v14 = vmul.f32 %v4089_v57, %v4104_v21  ;;  %v585_v13 = vmul.f32 %v4088_v59, %v4105_v31  ;;  %v3475_v25 = vld [vmem:[#allocation2 + $0x20] sm:$0xff] }
 0x143   :  { %v1496_v48 = vadd.f32 %v1336_v40, %v1147_v55  ;;  %v1497_v51 = vadd.f32 %v1337_v41, %v1148_v60  ;;  %v586_v45 = vmul.f32 %v4089_v57, %v4105_v31  ;;  %v761_v23 = vadd.f32 %v4091_v15, %v581_v2  ;;  %v4113_v43 = vld [vmem:[#allocation8_spill] sm:$0xff] }
 0x144   :  { %2286 = vmatpush3.bf16.msra.mxu0 %v2285_v17  ;;  %v762_v34 = vadd.f32 %v4092_v39, %v582_v14  ;;  %v765_v62 = vadd.f32 %v4091_v15, %v585_v13  ;;  %v957_v47 = vmul.f32 %v4090_v3, %v4105_v31  ;;  %v958_v10 = vmul.f32 %v4093_v44, %v4105_v31 }
 0x145   :  { %v1612_v22 = vmax.f32 %v1492_v50, %v1496_v48  ;;  %v1613_v6 = vmax.f32 %v1493_v4, %v1497_v51  ;;  %v766_v38 = vadd.f32 %v4092_v39, %v586_v45  ;;  %v961_v37 = vmul.f32 %v4090_v3, %v4112_v18  ;;  %v1740_v50 = vld [vmem:[%s3997_s4] sm:$0xff] }
 0x146   :  { %v962_v8 = vmul.f32 %v4093_v44, %v4112_v18  ;;  %v1117_v7 = vadd.f32 %v957_v47, %v761_v23  ;;  %v1118_v30 = vadd.f32 %v958_v10, %v762_v34  ;;  %v1306_v12 = vmul.f32 %v2835_v46, %v4112_v18  ;;  %1744 = vperm.xlu1 %2381, %v1740_v50   ;;  %v1741_v23 = vld [vmem:[%s3997_s4 + $0x8] sm:$0xff] }
 0x147   :  { %v1692_v19 = vmax.f32 %v1612_v22, 0.0  ;;  %v1693_v11 = vmax.f32 %v1613_v6, 0.0  ;;  %v1121_v32 = vadd.f32 %v961_v37, %v765_v62  ;;  %v1307_v52 = vmul.f32 %v2859_v26, %v4112_v18  ;;  %v4114_v6 = vld [vmem:[#allocation9_spill] sm:$0xff] }
 0x148   :  { %v1122_v58 = vadd.f32 %v962_v8, %v766_v38  ;;  %v1310_v28 = vmul.f32 %v2835_v46, %v4087_v9  ;;  %v1311_v36 = vmul.f32 %v2859_v26, %v4087_v9  ;;  %v1466_v33 = vadd.f32 %v1306_v12, %v1117_v7 }
 0x149   :  { %v2317_v55 = vpack.c.bf16 %v1693_v11, %v1692_v19  ;;  %v1467_v60 = vadd.f32 %v1307_v52, %v1118_v30  ;;  %v263_v40 = vrot.slane %v3475_v25, %v4113_v43  ;;  %v645_v41 = vmul.f32 %v4088_v59, %v4106_v35 }
 0x14a   :  { %v1470_v2 = vadd.f32 %v1310_v28, %v1121_v32  ;;  %v1471_v17 = vadd.f32 %v1311_v36, %v1122_v58  ;;  %v646_v4 = vmul.f32 %v4089_v57, %v4106_v35  ;;  %v649_v14 = vmul.f32 %v4088_v59, %v4107_v1  ;;  %1749 = vperm.xlu1 %2381, %v1741_v23  }
 0x14b   :  { %2318 = vmatpush3.bf16.msra.mxu1 %v2317_v55  ;;  %v271_v13 = vcombine.high %v263_v40, %v263_v40  ;;  %v3489_v48 = vrot.slane %v263_v40, %v4113_v43  ;;  %v650_v51 = vmul.f32 %v4089_v57, %v4107_v1  ;;  %v825_v45 = vadd.f32 %v4091_v15, %v645_v41 }
 0x14c   :  { %v1598_v34 = vmax.f32 %v1466_v33, %v1470_v2  ;;  %v1599_v62 = vmax.f32 %v1467_v60, %v1471_v17  ;;  %v826_v47 = vadd.f32 %v4092_v39, %v646_v4  ;;  %v829_v10 = vadd.f32 %v4091_v15, %v649_v14  ;;  %v1981_v60 = vld [vmem:[%s3999_s6] sm:$0xff] }
 0x14d   :  { %v3500_v22 = vrot.slane %v271_v13, %v4113_v43  ;;  %v3504_v38 = vrot.slane %v3489_v48, %v4114_v6  ;;  %v830_v37 = vadd.f32 %v4092_v39, %v650_v51  ;;  %v1021_v8 = vmul.f32 %v4090_v3, %v4107_v1 }
 0x14e   :  { %v1678_v7 = vmax.f32 %v1598_v34, 0.0  ;;  %v1679_v30 = vmax.f32 %v1599_v62, 0.0  ;;  %v1022_v12 = vmul.f32 %v4093_v44, %v4107_v1  ;;  %v549_v19 = vmul.f32 %v4088_v59, %v4108_v63  ;;  %1985 = vperm.xlu1 %2381, %v1981_v60  }
 0x14f   :  { %v3515_v11 = vrot.slane %v3500_v22, %v4114_v6  ;;  %v1025_v32 = vmul.f32 %v4090_v3, %v3504_v38  ;;  %v1026_v52 = vmul.f32 %v4093_v44, %v3504_v38  ;;  %v1181_v58 = vadd.f32 %v1021_v8, %v825_v45 }
 0x150   :  { %v2287_v28 = vpack.c.bf16 %v1679_v30, %v1678_v7  ;;  %v1182_v36 = vadd.f32 %v1022_v12, %v826_v47  ;;  %v1370_v33 = vmul.f32 %v2835_v46, %v3504_v38  ;;  %v1371_v55 = vmul.f32 %v2859_v26, %v3504_v38  ;;  %v4115_v12 = vld [vmem:[#allocation10_spill] sm:$0xff] }
 0x151   :  { %v1185_v40 = vadd.f32 %v1025_v32, %v829_v10  ;;  %v1186_v41 = vadd.f32 %v1026_v52, %v830_v37  ;;  %v1374_v50 = vmul.f32 %v2835_v46, %v3515_v11  ;;  %v1375_v2 = vmul.f32 %v2859_v26, %v3515_v11 }
 0x152   :  { %2288 = vmatprep.subr.bf16.mxu0 %v2287_v28  ;;  %v1530_v17 = vadd.f32 %v1370_v33, %v1181_v58  ;;  %v1531_v4 = vadd.f32 %v1371_v55, %v1182_v36  ;;  %v550_v14 = vmul.f32 %v4089_v57, %v4108_v63  ;;  %v553_v13 = vmul.f32 %v4088_v59, %v4109_v27 }
 0x153   :  { %v1534_v51 = vadd.f32 %v1374_v50, %v1185_v40  ;;  %v1535_v45 = vadd.f32 %v1375_v2, %v1186_v41  ;;  %v554_v23 = vmul.f32 %v4089_v57, %v4109_v27  ;;  %v729_v34 = vadd.f32 %v4091_v15, %v549_v19 }
 0x154   :  { %v730_v62 = vadd.f32 %v4092_v39, %v550_v14  ;;  %v733_v47 = vadd.f32 %v4091_v15, %v553_v13  ;;  %v925_v10 = vmul.f32 %v4090_v3, %v4109_v27  ;;  %v926_v37 = vmul.f32 %v4093_v44, %v4109_v27 }
 0x155   :  { %v1630_v8 = vmax.f32 %v1530_v17, %v1534_v51  ;;  %v1631_v7 = vmax.f32 %v1531_v4, %v1535_v45  ;;  %v734_v30 = vadd.f32 %v4092_v39, %v554_v23  ;;  %v929_v32 = vmul.f32 %v4090_v3, %v4115_v12 }
 0x156   :  { %v930_v19 = vmul.f32 %v4093_v44, %v4115_v12  ;;  %v1085_v52 = vadd.f32 %v925_v10, %v729_v34  ;;  %v1086_v58 = vadd.f32 %v926_v37, %v730_v62  ;;  %v1274_v28 = vmul.f32 %v2835_v46, %v4115_v12 }
 0x157   :  { %v1710_v36 = vmax.f32 %v1630_v8, 0.0  ;;  %v1711_v33 = vmax.f32 %v1631_v7, 0.0  ;;  %v1089_v55 = vadd.f32 %v929_v32, %v733_v47  ;;  %v1275_v60 = vmul.f32 %v2859_v26, %v4115_v12 }
 0x158   :  { %v1090_v40 = vadd.f32 %v930_v19, %v734_v30  ;;  %v1278_v41 = vmul.f32 %v2835_v46, %v2556_v54  ;;  %v1279_v50 = vmul.f32 %v2859_v26, %v2556_v54  ;;  %v1434_v2 = vadd.f32 %v1274_v28, %v1085_v52  ;;  %v4116_v19 = vld [vmem:[#allocation11_spill] sm:$0xff] }
 0x159   :  { %v2319_v17 = vpack.c.bf16 %v1711_v33, %v1710_v36  ;;  %v1435_v4 = vadd.f32 %v1275_v60, %v1086_v58  ;;  %v613_v14 = vmul.f32 %v4088_v59, %v4110_v5  ;;  %v614_v13 = vmul.f32 %v4089_v57, %v4110_v5 }
 0x15a   :  { %v1438_v51 = vadd.f32 %v1278_v41, %v1089_v55  ;;  %v1439_v45 = vadd.f32 %v1279_v50, %v1090_v40  ;;  %v617_v23 = vmul.f32 %v4088_v59, %v4111_v61  ;;  %v618_v34 = vmul.f32 %v4089_v57, %v4111_v61 }
 0x15b   :  { %2320 = vmatprep.subr.bf16.mxu1 %v2319_v17  ;;  %v793_v62 = vadd.f32 %v4091_v15, %v613_v14  ;;  %v794_v47 = vadd.f32 %v4092_v39, %v614_v13  ;;  %v989_v10 = vmul.f32 %v4090_v3, %v4111_v61  ;;  %v990_v37 = vmul.f32 %v4093_v44, %v4111_v61 }
 0x15c   :  { %v1582_v8 = vmax.f32 %v1434_v2, %v1438_v51  ;;  %v1583_v7 = vmax.f32 %v1435_v4, %v1439_v45  ;;  %v797_v30 = vadd.f32 %v4091_v15, %v617_v23  ;;  %v798_v32 = vadd.f32 %v4092_v39, %v618_v34 }
 0x15d   :  { %v993_v52 = vmul.f32 %v4090_v3, %v4116_v19  ;;  %v994_v58 = vmul.f32 %v4093_v44, %v4116_v19  ;;  %v1149_v28 = vadd.f32 %v989_v10, %v793_v62  ;;  %v1150_v36 = vadd.f32 %v990_v37, %v794_v47 }
 0x15e   :  { %v1662_v33 = vmax.f32 %v1582_v8, 0.0  ;;  %v1663_v55 = vmax.f32 %v1583_v7, 0.0  ;;  %v1338_v60 = vmul.f32 %v2835_v46, %v4116_v19  ;;  %v1339_v40 = vmul.f32 %v2859_v26, %v4116_v19 }
 0x15f   :  { %v1153_v41 = vadd.f32 %v993_v52, %v797_v30  ;;  %v1154_v50 = vadd.f32 %v994_v58, %v798_v32  ;;  %v1342_v2 = vmul.f32 %v2835_v46, %v2562_v56  ;;  %v1343_v17 = vmul.f32 %v2859_v26, %v2562_v56 }
 0x160   :  { %v2289_v4 = vpack.c.bf16 %v1663_v55, %v1662_v33  ;;  %v1498_v14 = vadd.f32 %v1338_v60, %v1149_v28  ;;  %v1499_v13 = vadd.f32 %v1339_v40, %v1150_v36  ;;  %v583_v51 = vmul.f32 %v4102_v42, %v4104_v21 }
 0x161   :  { %v1502_v45 = vadd.f32 %v1342_v2, %v1153_v41  ;;  %v1503_v23 = vadd.f32 %v1343_v17, %v1154_v50  ;;  %v584_v34 = vmul.f32 %v4103_v0, %v4104_v21  ;;  %v587_v62 = vmul.f32 %v4102_v42, %v4105_v31 }
 0x162   :  { %2290 = vmatpush3.bf16.msra.mxu0 %v2289_v4  ;;  %v588_v47 = vmul.f32 %v4103_v0, %v4105_v31  ;;  %v763_v10 = vadd.f32 %v2761_v20, %v583_v51  ;;  %v959_v37 = vmul.f32 %v2878_v16, %v4105_v31  ;;  %v960_v8 = vmul.f32 %v2896_v29, %v4105_v31 }
 0x163   :  { %v1614_v7 = vmax.f32 %v1498_v14, %v1502_v45  ;;  %v1615_v30 = vmax.f32 %v1499_v13, %v1503_v23  ;;  %v764_v32 = vadd.f32 %v2880_v53, %v584_v34  ;;  %v767_v21 = vadd.f32 %v2761_v20, %v587_v62 }
 0x164   :  { %v768_v52 = vadd.f32 %v2880_v53, %v588_v47  ;;  %v963_v58 = vmul.f32 %v2878_v16, %v4112_v18  ;;  %v964_v28 = vmul.f32 %v2896_v29, %v4112_v18  ;;  %v1119_v36 = vadd.f32 %v959_v37, %v763_v10 }
 0x165   :  { %v1694_v33 = vmax.f32 %v1614_v7, 0.0  ;;  %v1695_v55 = vmax.f32 %v1615_v30, 0.0  ;;  %v1120_v60 = vadd.f32 %v960_v8, %v764_v32  ;;  %v1308_v31 = vmul.f32 %v2919_v24, %v4112_v18 }
 0x166   :  { %v1123_v40 = vadd.f32 %v963_v58, %v767_v21  ;;  %v1124_v41 = vadd.f32 %v964_v28, %v768_v52  ;;  %v1309_v50 = vmul.f32 %v2894_v49, %v4112_v18  ;;  %v1312_v2 = vmul.f32 %v2919_v24, %v4087_v9 }
 0x167   :  { %v2321_v17 = vpack.c.bf16 %v1695_v55, %v1694_v33  ;;  %v1313_v4 = vmul.f32 %v2894_v49, %v4087_v9  ;;  %v1468_v14 = vadd.f32 %v1308_v31, %v1119_v36  ;;  %v647_v13 = vmul.f32 %v4102_v42, %v4106_v35 }
 0x168   :  { %v1469_v51 = vadd.f32 %v1309_v50, %v1120_v60  ;;  %v1472_v45 = vadd.f32 %v1312_v2, %v1123_v40  ;;  %v648_v23 = vmul.f32 %v4103_v0, %v4106_v35  ;;  %v651_v34 = vmul.f32 %v4102_v42, %v4107_v1 }
 0x169   :  { %2322 = vmatpush3.bf16.msra.mxu1 %v2321_v17  ;;  %v1473_v18 = vadd.f32 %v1313_v4, %v1124_v41  ;;  %v652_v62 = vmul.f32 %v4103_v0, %v4107_v1  ;;  %v827_v47 = vadd.f32 %v2761_v20, %v647_v13  ;;  %v1023_v9 = vmul.f32 %v2878_v16, %v4107_v1 }
 0x16a   :  { %v1600_v10 = vmax.f32 %v1468_v14, %v1472_v45  ;;  %v828_v37 = vadd.f32 %v2880_v53, %v648_v23  ;;  %v831_v8 = vadd.f32 %v2761_v20, %v651_v34  ;;  %v1024_v35 = vmul.f32 %v2896_v29, %v4107_v1 }
 0x16b   :  { %v1601_v7 = vmax.f32 %v1469_v51, %v1473_v18  ;;  %v832_v30 = vadd.f32 %v2880_v53, %v652_v62  ;;  %v1027_v32 = vmul.f32 %v2878_v16, %v3504_v38  ;;  %v1028_v21 = vmul.f32 %v2896_v29, %v3504_v38 }
 0x16c   :  { %v1680_v52 = vmax.f32 %v1600_v10, 0.0  ;;  %v1183_v58 = vadd.f32 %v1023_v9, %v827_v47  ;;  %v1184_v28 = vadd.f32 %v1024_v35, %v828_v37  ;;  %v1372_v36 = vmul.f32 %v2919_v24, %v3504_v38 }
 0x16d   :  { %v1681_v33 = vmax.f32 %v1601_v7, 0.0  ;;  %v1187_v55 = vadd.f32 %v1027_v32, %v831_v8  ;;  %v1188_v60 = vadd.f32 %v1028_v21, %v832_v30  ;;  %v1373_v1 = vmul.f32 %v2894_v49, %v3504_v38 }
 0x16e   :  { %v1376_v31 = vmul.f32 %v2919_v24, %v3515_v11  ;;  %v1377_v40 = vmul.f32 %v2894_v49, %v3515_v11  ;;  %v1532_v41 = vadd.f32 %v1372_v36, %v1183_v58  ;;  %v551_v50 = vmul.f32 %v4102_v42, %v4108_v63 }
 0x16f   :  { %v2291_v2 = vpack.c.bf16 %v1681_v33, %v1680_v52  ;;  %v1533_v17 = vadd.f32 %v1373_v1, %v1184_v28  ;;  %v552_v4 = vmul.f32 %v4103_v0, %v4108_v63  ;;  %v555_v14 = vmul.f32 %v4102_v42, %v4109_v27 }
 0x170   :  { %v1536_v13 = vadd.f32 %v1376_v31, %v1187_v55  ;;  %v1537_v51 = vadd.f32 %v1377_v40, %v1188_v60  ;;  %v556_v45 = vmul.f32 %v4103_v0, %v4109_v27  ;;  %v731_v23 = vadd.f32 %v2761_v20, %v551_v50 }
 0x171   :  { %2292 = vmatprep.subr.bf16.mxu0 %v2291_v2  ;;  %v732_v34 = vadd.f32 %v2880_v53, %v552_v4  ;;  %v735_v18 = vadd.f32 %v2761_v20, %v555_v14  ;;  %v927_v62 = vmul.f32 %v2878_v16, %v4109_v27  ;;  %v928_v63 = vmul.f32 %v2896_v29, %v4109_v27 }
 0x172   :  { %v1632_v47 = vmax.f32 %v1532_v41, %v1536_v13  ;;  %v1633_v9 = vmax.f32 %v1533_v17, %v1537_v51  ;;  %v736_v10 = vadd.f32 %v2880_v53, %v556_v45  ;;  %v931_v37 = vmul.f32 %v2878_v16, %v4115_v12 }
 0x173   :  { %v932_v8 = vmul.f32 %v2896_v29, %v4115_v12  ;;  %v1087_v35 = vadd.f32 %v927_v62, %v731_v23  ;;  %v1088_v7 = vadd.f32 %v928_v63, %v732_v34  ;;  %v1276_v30 = vmul.f32 %v2919_v24, %v4115_v12 }
 0x174   :  { %v1712_v32 = vmax.f32 %v1632_v47, 0.0  ;;  %v1713_v21 = vmax.f32 %v1633_v9, 0.0  ;;  %v1091_v52 = vadd.f32 %v931_v37, %v735_v18  ;;  %v1277_v27 = vmul.f32 %v2894_v49, %v4115_v12 }
 0x175   :  { %v1092_v58 = vadd.f32 %v932_v8, %v736_v10  ;;  %v1280_v28 = vmul.f32 %v2919_v24, %v2556_v54  ;;  %v1281_v36 = vmul.f32 %v2894_v49, %v2556_v54  ;;  %v1436_v33 = vadd.f32 %v1276_v30, %v1087_v35 }
 0x176   :  { %v2323_v55 = vpack.c.bf16 %v1713_v21, %v1712_v32  ;;  %v1437_v60 = vadd.f32 %v1277_v27, %v1088_v7  ;;  %v615_v1 = vmul.f32 %v4102_v42, %v4110_v5  ;;  %v616_v31 = vmul.f32 %v4103_v0, %v4110_v5 }
 0x177   :  { %v1440_v40 = vadd.f32 %v1280_v28, %v1091_v52  ;;  %v1441_v41 = vadd.f32 %v1281_v36, %v1092_v58  ;;  %v619_v12 = vmul.f32 %v4102_v42, %v4111_v61  ;;  %v620_v50 = vmul.f32 %v4103_v0, %v4111_v61 }
 0x178   :  { %2324 = vmatprep.subr.bf16.mxu1 %v2323_v55  ;;  %v795_v54 = vadd.f32 %v2761_v20, %v615_v1  ;;  %v796_v2 = vadd.f32 %v2880_v53, %v616_v31  ;;  %v991_v17 = vmul.f32 %v2878_v16, %v4111_v61  ;;  %v992_v4 = vmul.f32 %v2896_v29, %v4111_v61  ;;  %v1736_v1 = vld [vmem:[%s3996_s3 + $0x30] sm:$0xff] }
 0x179   :  { %v1584_v5 = vmax.f32 %v1436_v33, %v1440_v40  ;;  %v1585_v14 = vmax.f32 %v1437_v60, %v1441_v41  ;;  %v799_v13 = vadd.f32 %v2761_v20, %v619_v12  ;;  %v800_v51 = vadd.f32 %v2880_v53, %v620_v50 }
 0x17a   :  { %v995_v45 = vmul.f32 %v2878_v16, %v4116_v19  ;;  %v996_v23 = vmul.f32 %v2896_v29, %v4116_v19  ;;  %v1151_v34 = vadd.f32 %v991_v17, %v795_v54  ;;  %v1152_v18 = vadd.f32 %v992_v4, %v796_v2 }
 0x17b   :  { %v1664_v62 = vmax.f32 %v1584_v5, 0.0  ;;  %v1665_v63 = vmax.f32 %v1585_v14, 0.0  ;;  %v1340_v47 = vmul.f32 %v2919_v24, %v4116_v19  ;;  %v1341_v61 = vmul.f32 %v2894_v49, %v4116_v19 }
 0x17c   :  { %v1155_v9 = vadd.f32 %v995_v45, %v799_v13  ;;  %v1156_v10 = vadd.f32 %v996_v23, %v800_v51  ;;  %v1344_v37 = vmul.f32 %v2919_v24, %v2562_v56  ;;  %v1345_v8 = vmul.f32 %v2894_v49, %v2562_v56 }
 0x17d   :  { %v2293_v35 = vpack.c.bf16 %v1665_v63, %v1664_v62  ;;  %v1500_v7 = vadd.f32 %v1340_v47, %v1151_v34  ;;  %v1501_v30 = vadd.f32 %v1341_v61, %v1152_v18  ;;  %v301_v32 = vcombine.high %v3489_v48, %v3489_v48  ;;  %v1735_v18 = vld [vmem:[%s3996_s3 + $0x28] sm:$0xff] }
 0x17e   :  { %v1504_v21 = vadd.f32 %v1344_v37, %v1155_v9  ;;  %v1505_v52 = vadd.f32 %v1345_v8, %v1156_v10  ;;  %v303_v27 = vcombine.high %v3500_v22, %v3500_v22  ;;  %v653_v19 = vmul.f32 %v4088_v59, %v3504_v38  ;;  %v1730_v22 = vld [vmem:[%s3996_s3] sm:$0xff]  ;;  %v1732_v8 = vld [vmem:[%s3996_s3 + $0x10] sm:$0xff] }
 0x17f   :  { %2294 = vmatpush3.bf16.msra.mxu0 %v2293_v35  ;;  %v3705_v58 = vrot.slane %v301_v32, %v4114_v6  ;;  %v654_v56 = vmul.f32 %v4089_v57, %v3504_v38  ;;  %v657_v28 = vmul.f32 %v4088_v59, %v3515_v11  ;;  %v658_v48 = vmul.f32 %v4089_v57, %v3515_v11  ;;  %v1734_v9 = vld [vmem:[%s3996_s3 + $0x20] sm:$0xff] }
 0x180   :  { %v1616_v36 = vmax.f32 %v1500_v7, %v1504_v21  ;;  %v1617_v33 = vmax.f32 %v1501_v30, %v1505_v52  ;;  %v3717_v55 = vrot.slane %v303_v27, %v4114_v6  ;;  %v833_v60 = vadd.f32 %v4091_v15, %v653_v19  ;;  %v1738_v27 = vld [vmem:[%s3996_s3 + $0x40] sm:$0xff] }
 0x181   :  { %v834_v31 = vadd.f32 %v4092_v39, %v654_v56  ;;  %v837_v40 = vadd.f32 %v4091_v15, %v657_v28  ;;  %v838_v41 = vadd.f32 %v4092_v39, %v658_v48  ;;  %v1029_v12 = vmul.f32 %v4090_v3, %v3515_v11 }
 0x182   :  { %v1696_v50 = vmax.f32 %v1616_v36, 0.0  ;;  %v1697_v54 = vmax.f32 %v1617_v33, 0.0  ;;  %v1030_v2 = vmul.f32 %v4093_v44, %v3515_v11  ;;  %v1033_v17 = vmul.f32 %v4090_v3, %v3705_v58  ;;  %1817 = vmatmul.mubr.f32.vlgmr.msra.gmra.mrb[0].mxu0 %v1730_v22 }
 0x183   :  { %v1034_v4 = vmul.f32 %v4093_v44, %v3705_v58  ;;  %v1189_v5 = vadd.f32 %v1029_v12, %v833_v60  ;;  %v1378_v14 = vmul.f32 %v2835_v46, %v3705_v58  ;;  %v1379_v13 = vmul.f32 %v2859_v26, %v3705_v58  ;;  %1821 = vmatprep.mubr.f32.mxu0 %v1736_v1 }
 0x184   :  { %v2325_v51 = vpack.c.bf16 %v1697_v54, %v1696_v50  ;;  %v1190_v45 = vadd.f32 %v1030_v2, %v834_v31  ;;  %v1193_v23 = vadd.f32 %v1033_v17, %v837_v40  ;;  %v1382_v34 = vmul.f32 %v2835_v46, %v3717_v55 }
 0x185   :  { %v1194_v62 = vadd.f32 %v1034_v4, %v838_v41  ;;  %v1383_v63 = vmul.f32 %v2859_v26, %v3717_v55  ;;  %v1538_v47 = vadd.f32 %v1378_v14, %v1189_v5  ;;  %v655_v61 = vmul.f32 %v4102_v42, %v3504_v38 }
 0x186   :  { %2326 = vmatpush3.bf16.msra.mxu1 %v2325_v51  ;;  %v1539_v10 = vadd.f32 %v1379_v13, %v1190_v45  ;;  %v1542_v37 = vadd.f32 %v1382_v34, %v1193_v23  ;;  %v656_v35 = vmul.f32 %v4103_v0, %v3504_v38  ;;  %v659_v7 = vmul.f32 %v4102_v42, %v3515_v11 }
 0x187   :  { %v1543_v30 = vadd.f32 %v1383_v63, %v1194_v62  ;;  %v660_v32 = vmul.f32 %v4103_v0, %v3515_v11  ;;  %v835_v21 = vadd.f32 %v2761_v20, %v655_v61  ;;  %v1031_v52 = vmul.f32 %v2878_v16, %v3515_v11  ;;  %1822 = vmatmul.mubr.f32.gmra.mrb[2].mxu0 %v1735_v18 }
 0x188   :  { %v1634_v19 = vmax.f32 %v1538_v47, %v1542_v37  ;;  %v836_v38 = vadd.f32 %v2880_v53, %v656_v35  ;;  %v839_v56 = vadd.f32 %v2761_v20, %v659_v7  ;;  %v1032_v28 = vmul.f32 %v2896_v29, %v3515_v11  ;;  %2253 = vmatprep.mubr.f32.mxu0 %v1734_v9  ;;  %v1737_v11 = vld [vmem:[%s3996_s3 + $0x38] sm:$0xff] }
 0x189   :  { %v1635_v48 = vmax.f32 %v1539_v10, %v1543_v30  ;;  %1892 = vmatmul.mubr.f32.vlgmr.msra.gmra.mrb[0].mxu1 %v1732_v8  ;;  %v840_v22 = vadd.f32 %v2880_v53, %v660_v32  ;;  %v1035_v36 = vmul.f32 %v2878_v16, %v3705_v58  ;;  %v1036_v33 = vmul.f32 %v2896_v29, %v3705_v58 }
 0x18a   :  { %v1714_v60 = vmax.f32 %v1634_v19, 0.0  ;;  %v1191_v1 = vadd.f32 %v1031_v52, %v835_v21  ;;  %v1192_v31 = vadd.f32 %v1032_v28, %v836_v38  ;;  %v1380_v40 = vmul.f32 %v2919_v24, %v3705_v58  ;;  %1896 = vmatprep.mubr.f32.mxu1 %v1738_v27 }
 0x18b   :  { %v1715_v41 = vmax.f32 %v1635_v48, 0.0  ;;  %v1195_v12 = vadd.f32 %v1035_v36, %v839_v56  ;;  %v1196_v50 = vadd.f32 %v1036_v33, %v840_v22  ;;  %v1381_v54 = vmul.f32 %v2894_v49, %v3705_v58 }
 0x18c   :  { %v1384_v2 = vmul.f32 %v2919_v24, %v3717_v55  ;;  %v1385_v17 = vmul.f32 %v2894_v49, %v3717_v55  ;;  %v1540_v4 = vadd.f32 %v1380_v40, %v1191_v1  ;;  %v256_v5 = vcombine.high %v3475_v25, %v3475_v25 }
 0x18d   :  { %v2327_v14 = vpack.c.bf16 %v1715_v41, %v1714_v60  ;;  %v1541_v13 = vadd.f32 %v1381_v54, %v1192_v31  ;;  %v661_v51 = vmul.f32 %v4088_v59, %v3705_v58  ;;  %v662_v45 = vmul.f32 %v4089_v57, %v3705_v58  ;;  %1897 = vmatmul.mubr.f32.gmra.mrb[2].mxu1 %v1737_v11 }
 0x18e   :  { %v1544_v23 = vadd.f32 %v1384_v2, %v1195_v12  ;;  %v1545_v34 = vadd.f32 %v1385_v17, %v1196_v50  ;;  %v270_v18 = vrot.slane %v256_v5, %v4113_v43  ;;  %v665_v62 = vmul.f32 %v4088_v59, %v3717_v55 }
 0x18f   :  { %2328 = vmatprep.subr.bf16.mxu0 %v2327_v14  ;;  %v666_v25 = vmul.f32 %v4089_v57, %v3717_v55  ;;  %v841_v63 = vadd.f32 %v4091_v15, %v661_v51  ;;  %v842_v47 = vadd.f32 %v4092_v39, %v662_v45  ;;  %v1037_v61 = vmul.f32 %v4090_v3, %v3717_v55 }
 0x190   :  { %2330 = vmatpush3.bf16.msra.mxu0 %v2327_v14  ;;  %v1636_v9 = vmax.f32 %v1540_v4, %v1544_v23  ;;  %v1637_v10 = vmax.f32 %v1541_v13, %v1545_v34  ;;  %v272_v37 = vcombine.high %v270_v18, %v270_v18  ;;  %v286_v8 = vrot.slane %v270_v18, %v4113_v43 }
 0x191   :  { %v845_v35 = vadd.f32 %v4091_v15, %v665_v62  ;;  %v846_v7 = vadd.f32 %v4092_v39, %v666_v25  ;;  %v1038_v30 = vmul.f32 %v4093_v44, %v3717_v55  ;;  %v1197_v32 = vadd.f32 %v1037_v61, %v841_v63 }
 0x192   :  { %v1716_v21 = vmax.f32 %v1636_v9, 0.0  ;;  %v1717_v52 = vmax.f32 %v1637_v10, 0.0  ;;  %v300_v27 = vrot.slane %v272_v37, %v4113_v43  ;;  %v3807_v19 = vrot.slane %v286_v8, %v4114_v6 }
 0x193   :  { %v1198_v38 = vadd.f32 %v1038_v30, %v842_v47  ;;  %v663_v56 = vmul.f32 %v4102_v42, %v3705_v58  ;;  %v664_v28 = vmul.f32 %v4103_v0, %v3705_v58  ;;  %v667_v48 = vmul.f32 %v4102_v42, %v3717_v55 }
 0x194   :  { %v2331_v22 = vpack.c.bf16 %v1717_v52, %v1716_v21  ;;  %v3816_v36 = vrot.slane %v300_v27, %v4114_v6  ;;  %v1041_v33 = vmul.f32 %v4090_v3, %v3807_v19  ;;  %v1042_v60 = vmul.f32 %v4093_v44, %v3807_v19 }
 0x195   :  { %v1386_v1 = vmul.f32 %v2835_v46, %v3807_v19  ;;  %v1387_v31 = vmul.f32 %v2859_v26, %v3807_v19  ;;  %v668_v58 = vmul.f32 %v4103_v0, %v3717_v55  ;;  %v843_v40 = vadd.f32 %v2761_v20, %v663_v56 }
 0x196   :  { %2332 = vmatprep.subr.bf16.mxu0 %v2331_v22  ;;  %v1201_v11 = vadd.f32 %v1041_v33, %v845_v35  ;;  %v1202_v41 = vadd.f32 %v1042_v60, %v846_v7  ;;  %v1390_v12 = vmul.f32 %v2835_v46, %v3816_v36  ;;  %v1391_v50 = vmul.f32 %v2859_v26, %v3816_v36 }
 0x197   :  { %2334 = vmatpush3.bf16.msra.mxu0 %v2331_v22  ;;  %v1546_v54 = vadd.f32 %v1386_v1, %v1197_v32  ;;  %v1547_v2 = vadd.f32 %v1387_v31, %v1198_v38  ;;  %v844_v17 = vadd.f32 %v2880_v53, %v664_v28  ;;  %v847_v4 = vadd.f32 %v2761_v20, %v667_v48 }
 0x198   :  { %v1550_v5 = vadd.f32 %v1390_v12, %v1201_v11  ;;  %v1551_v14 = vadd.f32 %v1391_v50, %v1202_v41  ;;  %v848_v13 = vadd.f32 %v2880_v53, %v668_v58  ;;  %v1039_v51 = vmul.f32 %v2878_v16, %v3717_v55 }
 0x199   :  { %v1040_v45 = vmul.f32 %v2896_v29, %v3717_v55  ;;  %v1043_v23 = vmul.f32 %v2878_v16, %v3807_v19  ;;  %v1044_v34 = vmul.f32 %v2896_v29, %v3807_v19  ;;  %v1388_v18 = vmul.f32 %v2919_v24, %v3807_v19 }
 0x19a   :  { %v1638_v62 = vmax.f32 %v1546_v54, %v1550_v5  ;;  %v1639_v25 = vmax.f32 %v1547_v2, %v1551_v14  ;;  %v1199_v63 = vadd.f32 %v1039_v51, %v843_v40  ;;  %v1389_v47 = vmul.f32 %v2894_v49, %v3807_v19 }
 0x19b   :  { %v1200_v61 = vadd.f32 %v1040_v45, %v844_v17  ;;  %v1203_v9 = vadd.f32 %v1043_v23, %v847_v4  ;;  %v1204_v10 = vadd.f32 %v1044_v34, %v848_v13  ;;  %v1392_v55 = vmul.f32 %v2919_v24, %v3816_v36 }
 0x19c   :  { %v1718_v37 = vmax.f32 %v1638_v62, 0.0  ;;  %v1719_v35 = vmax.f32 %v1639_v25, 0.0  ;;  %v1393_v7 = vmul.f32 %v2894_v49, %v3816_v36  ;;  %v1548_v30 = vadd.f32 %v1388_v18, %v1199_v63 }
 0x19d   :  { %v1549_v32 = vadd.f32 %v1389_v47, %v1200_v61  ;;  %v1552_v21 = vadd.f32 %v1392_v55, %v1203_v9  ;;  %v302_v52 = vcombine.high %v286_v8, %v286_v8  ;;  %v304_v38 = vcombine.high %v300_v27, %v300_v27 }
 0x19e   :  { %v2335_v56 = vpack.c.bf16 %v1719_v35, %v1718_v37  ;;  %v1553_v28 = vadd.f32 %v1393_v7, %v1204_v10  ;;  %v669_v48 = vmul.f32 %v4088_v59, %v3807_v19  ;;  %v670_v22 = vmul.f32 %v4089_v57, %v3807_v19 }
 0x19f   :  { %v1640_v33 = vmax.f32 %v1548_v30, %v1552_v21  ;;  %v3857_v60 = vrot.slane %v302_v52, %v4114_v6  ;;  %v3860_v1 = vrot.slane %v304_v38, %v4114_v6  ;;  %v673_v31 = vmul.f32 %v4088_v59, %v3816_v36 }
 0x1a0   :  { %2336 = vmatprep.subr.bf16.mxu0 %v2335_v56  ;;  %v1641_v8 = vmax.f32 %v1549_v32, %v1553_v28  ;;  %v674_v27 = vmul.f32 %v4089_v57, %v3816_v36  ;;  %v849_v58 = vadd.f32 %v4091_v15, %v669_v48  ;;  %v850_v40 = vadd.f32 %v4092_v39, %v670_v22 }
 0x1a1   :  { %2338 = vmatpush3.bf16.msra.mxu0 %v2335_v56  ;;  %v1720_v11 = vmax.f32 %v1640_v33, 0.0  ;;  %v853_v41 = vadd.f32 %v4091_v15, %v673_v31  ;;  %v1045_v12 = vmul.f32 %v4090_v3, %v3816_v36  ;;  %v1046_v50 = vmul.f32 %v4093_v44, %v3816_v36 }
 0x1a2   :  { %v1721_v54 = vmax.f32 %v1641_v8, 0.0  ;;  %v854_v2 = vadd.f32 %v4092_v39, %v674_v27  ;;  %v1049_v17 = vmul.f32 %v4090_v3, %v3857_v60  ;;  %v1050_v4 = vmul.f32 %v4093_v44, %v3857_v60 }
 0x1a3   :  { %v1205_v5 = vadd.f32 %v1045_v12, %v849_v58  ;;  %v1206_v14 = vadd.f32 %v1046_v50, %v850_v40  ;;  %v1394_v13 = vmul.f32 %v2835_v46, %v3857_v60  ;;  %v1395_v51 = vmul.f32 %v2859_v26, %v3857_v60 }
 0x1a4   :  { %v2339_v45 = vpack.c.bf16 %v1721_v54, %v1720_v11  ;;  %v1209_v23 = vadd.f32 %v1049_v17, %v853_v41  ;;  %v1210_v34 = vadd.f32 %v1050_v4, %v854_v2  ;;  %v1398_v18 = vmul.f32 %v2835_v46, %v3860_v1  ;;  %v2120_v11 = vld.sshfl [vmem:[#allocation2 + $0x28] sm:$0x11 pattern:$0x75316420] }
 0x1a5   :  { %v1399_v62 = vmul.f32 %v2859_v26, %v3860_v1  ;;  %v1554_v25 = vadd.f32 %v1394_v13, %v1205_v5  ;;  %v1555_v63 = vadd.f32 %v1395_v51, %v1206_v14  ;;  %v671_v47 = vmul.f32 %v4102_v42, %v3807_v19 }
 0x1a6   :  { %2340 = vmatprep.subr.bf16.mxu0 %v2339_v45  ;;  %v1558_v61 = vadd.f32 %v1398_v18, %v1209_v23  ;;  %v672_v9 = vmul.f32 %v4103_v0, %v3807_v19  ;;  %v675_v10 = vmul.f32 %v4102_v42, %v3816_v36  ;;  %v676_v55 = vmul.f32 %v4103_v0, %v3816_v36 }
 0x1a7   :  { %2342 = vmatpush3.bf16.msra.mxu0 %v2339_v45  ;;  %v1559_v37 = vadd.f32 %v1399_v62, %v1210_v34  ;;  %v851_v35 = vadd.f32 %v2761_v20, %v671_v47  ;;  %v1047_v7 = vmul.f32 %v2878_v16, %v3816_v36  ;;  %v1048_v30 = vmul.f32 %v2896_v29, %v3816_v36 }
 0x1a8   :  { %v1642_v32 = vmax.f32 %v1554_v25, %v1558_v61  ;;  %v852_v21 = vadd.f32 %v2880_v53, %v672_v9  ;;  %v855_v19 = vadd.f32 %v2761_v20, %v675_v10  ;;  %v856_v52 = vadd.f32 %v2880_v53, %v676_v55 }
 0x1a9   :  { %v1643_v38 = vmax.f32 %v1555_v63, %v1559_v37  ;;  %v1051_v56 = vmul.f32 %v2878_v16, %v3857_v60  ;;  %v1052_v28 = vmul.f32 %v2896_v29, %v3857_v60  ;;  %v1207_v48 = vadd.f32 %v1047_v7, %v851_v35 }
 0x1aa   :  { %v1722_v22 = vmax.f32 %v1642_v32, 0.0  ;;  %v1208_v33 = vadd.f32 %v1048_v30, %v852_v21  ;;  %v1396_v36 = vmul.f32 %v2919_v24, %v3857_v60  ;;  %v1397_v31 = vmul.f32 %v2894_v49, %v3857_v60 }
 0x1ab   :  { %v1723_v8 = vmax.f32 %v1643_v38, 0.0  ;;  %v1211_v27 = vadd.f32 %v1051_v56, %v855_v19  ;;  %v1212_v58 = vadd.f32 %v1052_v28, %v856_v52  ;;  %v1400_v40 = vmul.f32 %v2919_v24, %v3860_v1 }
 0x1ac   :  { %v1401_v41 = vmul.f32 %v2894_v49, %v3860_v1  ;;  %v1556_v12 = vadd.f32 %v1396_v36, %v1207_v48  ;;  %v1557_v50 = vadd.f32 %v1397_v31, %v1208_v33  ;;  %v677_v54 = vmul.f32 %v4088_v59, %v3857_v60 }
 0x1ad   :  { %v2343_v2 = vpack.c.bf16 %v1723_v8, %v1722_v22  ;;  %v1560_v17 = vadd.f32 %v1400_v40, %v1211_v27  ;;  %v678_v4 = vmul.f32 %v4089_v57, %v3857_v60  ;;  %v681_v5 = vmul.f32 %v4088_v59, %v3860_v1 }
 0x1ae   :  { %v1561_v14 = vadd.f32 %v1401_v41, %v1212_v58  ;;  %v682_v13 = vmul.f32 %v4089_v57, %v3860_v1  ;;  %v857_v51 = vadd.f32 %v4091_v15, %v677_v54  ;;  %v879_v45 = vrot.slane %v2120_v11, %v4113_v43 }
 0x1af   :  { %2344 = vmatprep.subr.bf16.mxu0 %v2343_v2  ;;  %v1644_v23 = vmax.f32 %v1556_v12, %v1560_v17  ;;  %v858_v34 = vadd.f32 %v4092_v39, %v678_v4  ;;  %v861_v18 = vadd.f32 %v4091_v15, %v681_v5  ;;  %v1053_v62 = vmul.f32 %v4090_v3, %v3860_v1 }
 0x1b0   :  { %2346 = vmatpush3.bf16.msra.mxu0 %v2343_v2  ;;  %v1645_v25 = vmax.f32 %v1557_v50, %v1561_v14  ;;  %v862_v59 = vadd.f32 %v4092_v39, %v682_v13  ;;  %v883_v63 = vrot.slane %v879_v45, %v4114_v6  ;;  %v1054_v57 = vmul.f32 %v4093_v44, %v3860_v1 }
 0x1b1   :  { %v1724_v47 = vmax.f32 %v1644_v23, 0.0  ;;  %v1213_v61 = vadd.f32 %v1053_v62, %v857_v51  ;;  %v1221_v9 = vcombine.high %v2120_v11, %v2120_v11  ;;  %v679_v10 = vmul.f32 %v4102_v42, %v3857_v60  ;;  %v1982_v23 = vld [vmem:[%s3999_s6 + $0x8] sm:$0x3] }
 0x1b2   :  { %v1725_v55 = vmax.f32 %v1645_v25, 0.0  ;;  %v1057_v15 = vmul.f32 %v4090_v3, %v883_v63  ;;  %v1058_v37 = vmul.f32 %v4093_v44, %v883_v63  ;;  %v1214_v35 = vadd.f32 %v1054_v57, %v858_v34  ;;  %1990 = vperm.xlu0 %2382, %v1982_v23  }
 0x1b3   :  { %v1228_v7 = vrot.slane %v1221_v9, %v4113_v43  ;;  %v1402_v39 = vmul.f32 %v2835_v46, %v883_v63  ;;  %v1403_v30 = vmul.f32 %v2859_v26, %v883_v63  ;;  %v680_v32 = vmul.f32 %v4103_v0, %v3857_v60 }
 0x1b4   :  { %v2347_v21 = vpack.c.bf16 %v1725_v55, %v1724_v47  ;;  %v1217_v19 = vadd.f32 %v1057_v15, %v861_v18  ;;  %v1218_v52 = vadd.f32 %v1058_v37, %v862_v59  ;;  %v683_v38 = vmul.f32 %v4102_v42, %v3860_v1 }
 0x1b5   :  { %v1232_v3 = vrot.slane %v1228_v7, %v4114_v6  ;;  %v1562_v56 = vadd.f32 %v1402_v39, %v1213_v61  ;;  %v1563_v44 = vadd.f32 %v1403_v30, %v1214_v35  ;;  %v684_v43 = vmul.f32 %v4103_v0, %v3860_v1 }
 0x1b6   :  { %2348 = vmatprep.subr.bf16.mxu0 %v2347_v21  ;;  %v859_v28 = vadd.f32 %v2761_v20, %v679_v10  ;;  %v860_v48 = vadd.f32 %v2880_v53, %v680_v32  ;;  %v863_v60 = vadd.f32 %v2761_v20, %v683_v38  ;;  %v1055_v22 = vmul.f32 %v2878_v16, %v3860_v1 }
 0x1b7   :  { %2350 = vmatpush3.bf16.msra.mxu0 %v2347_v21  ;;  %v1406_v42 = vmul.f32 %v2835_v46, %v1232_v3  ;;  %v1407_v6 = vmul.f32 %v2859_v26, %v1232_v3  ;;  %v864_v33 = vadd.f32 %v2880_v53, %v684_v43  ;;  %v1056_v0 = vmul.f32 %v2896_v29, %v3860_v1 }
 0x1b8   :  { %v1059_v36 = vmul.f32 %v2878_v16, %v883_v63  ;;  %v1060_v31 = vmul.f32 %v2896_v29, %v883_v63  ;;  %v1215_v8 = vadd.f32 %v1055_v22, %v859_v28  ;;  %v1404_v20 = vmul.f32 %v2919_v24, %v883_v63 }
 0x1b9   :  { %v1566_v27 = vadd.f32 %v1406_v42, %v1217_v19  ;;  %v1567_v58 = vadd.f32 %v1407_v6, %v1218_v52  ;;  %v1216_v40 = vadd.f32 %v1056_v0, %v860_v48  ;;  %v1405_v11 = vmul.f32 %v2894_v49, %v883_v63 }
 0x1ba   :  { %v1219_v46 = vadd.f32 %v1059_v36, %v863_v60  ;;  %v1220_v41 = vadd.f32 %v1060_v31, %v864_v33  ;;  %v1408_v26 = vmul.f32 %v2919_v24, %v1232_v3  ;;  %v1409_v53 = vmul.f32 %v2894_v49, %v1232_v3  ;;  %v1739_v49 = vld [vmem:[%s3996_s3 + $0x48] sm:$0xff]  ;;  %v1979_v24 = vld [vmem:[%s3998_s5] sm:$0xff] }
 0x1bb   :  { %v1646_v12 = vmax.f32 %v1562_v56, %v1566_v27  ;;  %v1647_v1 = vmax.f32 %v1563_v44, %v1567_v58  ;;  %v1564_v50 = vadd.f32 %v1404_v20, %v1215_v8  ;;  %v1565_v16 = vadd.f32 %v1405_v11, %v1216_v40  ;;  %2260 = vmatprep.mubr.msk.f32.mxu1 %vm1993_vm0, %v1979_v24  ;;  %v1980_v44 = vld [vmem:[%s3998_s5 + $0x8] sm:$0x3]  ;;  %s2449_s5 = smov [#allocation5]  }
 0x1bc   :  { %v1568_v54 = vadd.f32 %v1408_v26, %v1219_v46  ;;  %v1569_v29 = vadd.f32 %v1409_v53, %v1220_v41  ;;  %s2108_s10 = sshll.u32 %s2449_s5, 4  ;;  %s2109_s10 = int_to_ptr.vmem [resolvable:$true] %s2108_s10 }
 0x1bd   :  { %v1726_v2 = vmax.f32 %v1646_v12, 0.0  ;;  %v1727_v17 = vmax.f32 %v1647_v1, 0.0  ;;  %s2416_s13 = scalar_lea.vmem %s2109_s10, 256  ;;  %p2421_p9 = scmp.lt.s32.totalorder %s2109_s10, %s2109_s10 }
 0x1be   :  { %v1648_v4 = vmax.f32 %v1564_v50, %v1568_v54  ;;  %v1649_v5 = vmax.f32 %v1565_v16, %v1569_v29  ;;  %p2417_p8 = scmp.ne.s32.totalorder %s2109_s10, %s2416_s13  ;;  %p2422_p10 = scmp.lt.s32.totalorder %s2416_s13, %s2416_s13 }
 0x1bf   :  { %v2351_v14 = vpack.c.bf16 %v1727_v17, %v1726_v2 }
 0x1c0   :  { %v1728_v13 = vmax.f32 %v1648_v4, 0.0  ;;  %v1729_v51 = vmax.f32 %v1649_v5, 0.0  ;;  %p2423_p11 = por %p2422_p10, %p2421_p9 }
 0x1c1   :  { %2352 = vmatprep.subr.bf16.mxu0 %v2351_v14 }
 0x1c2   :  { %2354 = vmatpush3.bf16.msra.mxu0 %v2351_v14  ;;  %v2355_v45 = vpack.c.bf16 %v1729_v51, %v1728_v13  ;;  %p2424_p12 = pnand %p2423_p11, %p2417_p8 }
 0x1c4   :  { %2356 = vmatprep.subr.bf16.mxu0 %v2355_v45 }
 0x1c5   :  { %v1745_v25 = vpop.permute.xlu1 %1744 }
 0x1c6   :  { %2358 = vmatpush3.bf16.msra.mxu0 %v2355_v45 }
 0x1c9   :  { %2254 = vmatmul.mubr.f32.vlgmr.msra.gmra.mrb[4].mxu0 %v1739_v49  ;;  %v1750_v55 = vpop.permute.xlu1 %1749 }
 0x1cd   :  { %v1986_v48 = vpop.permute.xlu1 %1985 }
 0x231   :  { %v1991_v43 = vpop.permute.xlu0 %1990 }
 0x255   :  { %v2155_v34 = vpop.f32.mrb[0].mxu0 }
 0x256   :  { %v2156_v18 = vpop.f32.mrb[1].mxu0 }
 0x257   :  { %v2157_v62 = vadd.f32 %v2156_v18, %v2155_v34 }
 0x259   :  { %v1819_v47 = vadd.f32 %v2157_v62, %v1745_v25 }
 0x25a   :  { %v2158_v59 = vpop.f32.mrb[2].mxu0 }
 0x25b   :  { %v2159_v63 = vpop.f32.mrb[3].mxu0 }
 0x25c   :  { %v2193_v57 = vpop.f32.mrb[0].mxu1  ;;  %v2160_v61 = vadd.f32 %v2159_v63, %v2158_v59 }
 0x25d   :  { %v2194_v9 = vpop.f32.mrb[1].mxu1 }
 0x25e   :  { %v2195_v10 = vadd.f32 %v2194_v9, %v2193_v57  ;;  %v1824_v15 = vadd.f32 %v2160_v61, %v1750_v55 }
 0x260   :  { %v2196_v37 = vpop.f32.mrb[2].mxu1  ;;  %v1894_v35 = vadd.f32 %v2195_v10, %v1819_v47 }
 0x261   :  { %v2197_v7 = vpop.f32.mrb[3].mxu1 }
 0x262   :  { %v2198_v39 = vadd.f32 %v2197_v7, %v2196_v37 }
 0x264   :  { %v1899_v30 = vadd.f32 %v2198_v39, %v1824_v15 }
 0x29c   :  { %v2255_v32 = vpop.f32.mrb[4].mxu0 }
 0x29d   :  { %v1974_v21 = vadd.f32 %v2255_v32, %v1899_v30  ;;  %v1968_v19 = vpop.f32.mrb[5].mxu0 }
 0x29e   :  { %v1969_v52 = vadd.f32 %v1968_v19, %v1894_v35 }
 0x29f   :  { %v1978_v38 = vmax.f32 %v1974_v21, 0.0 }
 0x2a0   :  { %v1977_v3 = vmax.f32 %v1969_v52, 0.0 }
 0x2a2   :  { %v2359_v56 = vpack.c.bf16 %v1978_v38, %v1977_v3 }
 0x2a4   :  { %2360 = vmatprep.subr.bf16.mxu1 %v2359_v56 }
 0x2a5   :  { %2362 = vmatpush3.bf16.msra.mxu1 %v2359_v56 }
 0x2a8   :  { %2261 = vmatmul.mubr.msk.f32.vlgmr.msra.gmra.mrb[4].mxu1 %vm1993_vm0, %v1980_v44 }
 0x37b   :  { %v2262_v28 = vpop.f32.mrb[4].mxu1 }
 0x37c   :  { %v2072_v60 = vadd.f32 %v2262_v28, %v1991_v43  ;;  %v2066_v22 = vpop.f32.mrb[5].mxu1 }
 0x37d   :  { %v2067_v42 = vadd.f32 %v2066_v22, %v1986_v48 }
 0x37e   :  { %v2076_v6 = vsel %vm2075_vm1, %v2072_v60, -inf }
 0x37f   :  { %v2077_v33 = vmax.f32 %v2067_v42, %v2076_v6 }
 0x381   :  { %v2078_v0 = vrot.slane %v2077_v33, 4 }
 0x383   :  { %v2079_v36 = vmax.f32 %v2077_v33, %v2078_v0 }
 0x385   :  { %v2080_v31 = vrot.slane %v2079_v36, 2 }
 0x387   :  { %v2081_v8 = vmax.f32 %v2079_v36, %v2080_v31 }
 0x389   :  { %v2082_v20 = vrot.slane %v2081_v8, 1 }
 0x38b   :  { %v2083_v27 = vmax.f32 %v2081_v8, %v2082_v20 }
 0x38d   :  { %v2084_v58 = vsub.f32 %v2067_v42, %v2083_v27  ;;  %v2085_v40 = vsub.f32 %v2072_v60, %v2083_v27 }
 0x38f   :  { %v2086_v11 = vmul.f32 1.442695, %v2084_v58  ;;  %v2088_v46 = vmul.f32 1.442695, %v2085_v40 }
 0x391   :  { %2388 = vpow2.f32 %v2086_v11 }
 0x392   :  { %2390 = vpow2.f32 %v2088_v46 }
 0x39b   :  { %v2389_v41 = vpop.eup %2388 }
 0x39c   :  { %v2391_v26 = vpop.eup %2390 }
 0x39d   :  { %v2090_v53 = vsel %vm2075_vm1, %v2391_v26, 0.0 }
 0x39e   :  { %v2091_v12 = vadd.f32 %v2389_v41, %v2090_v53 }
 0x3a0   :  { %v2092_v1 = vrot.slane %v2091_v12, 4 }
 0x3a2   :  { %v2093_v50 = vadd.f32 %v2092_v1, %v2091_v12 }
 0x3a4   :  { %v2094_v16 = vrot.slane %v2093_v50, 2 }
 0x3a6   :  { %v2095_v54 = vadd.f32 %v2094_v16, %v2093_v50 }
 0x3a8   :  { %v2096_v29 = vrot.slane %v2095_v54, 1 }
 0x3aa   :  { %v2097_v2 = vadd.f32 %v2096_v29, %v2095_v54 }
 0x3ac   :  { %2392 = vrcp.f32 %v2097_v2 }
 0x3b6   :  { %v2393_v17 = vpop.eup %2392 }
 0x3b7   :  { %v2099_v4 = vmul.f32 %v2393_v17, %v2389_v41  ;;  %v2100_v5 = vmul.f32 %v2393_v17, %v2391_v26 }
 0x3b9   :  { %2101 = vst [vmem:[#allocation5] sm:$0xff] %v2099_v4  ;;  %2102 = vst [vmem:[#allocation5 + $0x8] sm:$0x3] %v2100_v5 }
 0x3ba   :  { %2427 = shalt.err (!%p2424_p12)
}
 0x3bb   :  { %s2428_s15 = scalar_lea.hbm %s4000_s7, 256 }
 0x3bc   :  { %p2429_p13 = scmp.ne.s32.totalorder %s4000_s7, %s2428_s15  ;;  %p2432_p0 = scmp.lt.u32.totalorder %s2428_s15, %s4000_s7 }
 0x3be   :  { %p2434_p1 = pnand %p2432_p0, %p2429_p13 }
 0x3c0   :  { %2437 = shalt.err (!%p2434_p1)
}
 0x3c1   :  { %2114 = dma.vmem_to_hbm [thread:$0]  %s2109_s10, 256, %s4000_s7, [#allocation4], %s2443_s11, %s2443_s11, %s2444_s12  }
 0x3c2   :  { %2440 = dma.done.wait [#allocation4], 256  }
 0x3c3   :  { %2441 = vsyncadd [#allocation4], 4294967040 }
 0x3c4   :  { %2118 = vsyncpa [#allocation3], 1 }
 0x3c5   :  { %2119 = vsyncpa [#allocation4], 1 }

</bundles_post_ra>
